<compile_context>
chip_gen: v7x
topology: tpu7x:2x2x1
jax: 0.10.0
libtpu: 0.0.40
codegen_flags: <defaults>
</compile_context>

<pallas_src>
import functools

import jax
import jax.numpy as jnp
from jax.experimental import pallas as pl
from jax.experimental.pallas import tpu as pltpu


# ----------------------------- fused kernel ----------------------------------
def _fused_kernel(x_ref, masks_ref,
                  c1t_ref, c1b_ref, c2t_ref, c2b_ref,
                  b1w1_ref, b1b1_ref, b1w2_ref, b1b2_ref,
                  b2w1_ref, b2b1_ref, b2w2_ref, b2b2_ref,
                  o_ref, *, h, w):
    hw = h * w
    x = x_ref[...].astype(jnp.float32)            # (N*C, H*W)
    m = masks_ref[...]                            # (4, H*W) float32 in {0, 1}
    row_first = m[0:1, :]                         # y == 0
    row_last = m[1:2, :]                          # y == H-1
    col_first = m[2:3, :]                         # x == 0
    col_last = m[3:4, :]                          # x == W-1

    def roll_lanes(a, shift):
        # pltpu.roll only accepts non-negative shifts; normalise modulo H*W.
        # result[p] = a[(p - shift) mod HW]  (jnp.roll semantics, lane axis).
        return pltpu.roll(a, shift % hw, 1)

    def sel(mask, a, b):
        # Arithmetic blend (mask is exactly 0/1) -> pure VPU, no exotic ops.
        return mask * a + (1.0 - mask) * b

    def conv3x3_instnorm(inp, taps_ref, bias_ref):
        # Reflect-pad 3x3 conv on a row-major (rows, H*W) tile, fully in VMEM.
        # Neighbouring rows/columns are lane rotations; the wrapped border
        # lanes are replaced with their reflection via the masks.
        up = roll_lanes(inp, w)      # value of row y-1 at position y
        dn = roll_lanes(inp, -w)     # value of row y+1 at position y
        rows = (sel(row_first, dn, up),   # ky=0: row y-1, reflect row -1 -> 1
                inp,                      # ky=1
                sel(row_last, up, dn))    # ky=2: row y+1, reflect row H -> H-2
        acc = jnp.zeros_like(inp)
        for ky in range(3):
            r = rows[ky]
            left = roll_lanes(r, 1)      # value of column x-1 at position x
            right = roll_lanes(r, -1)    # value of column x+1 at position x
            cols = (sel(col_first, right, left),  # kx=0: reflect col -1 -> 1
                    r,                            # kx=1
                    sel(col_last, left, right))   # kx=2: reflect col W -> W-2
            for kx in range(3):
                acc = acc + jnp.dot(taps_ref[ky * 3 + kx], cols[kx],
                                    preferred_element_type=jnp.float32)
        acc = acc + bias_ref[...]
        # InstanceNorm2d (affine=False, eps=1e-5, biased variance): per row,
        # which is per (n, c) since the batch is folded into the rows.
        mean = jnp.mean(acc, axis=1, keepdims=True)
        cen = acc - mean
        var = jnp.mean(cen * cen, axis=1, keepdims=True)
        return cen * jax.lax.rsqrt(var + 1e-5)

    def blk(inp, w1_ref, b1_ref, w2_ref, b2_ref):
        # conv1x1(C+E -> C+E) + ReLU + conv1x1(C+E -> C) + ReLU.
        # The concat with the spatially constant z is folded into b1 already.
        hid = jnp.dot(w1_ref[...], inp, preferred_element_type=jnp.float32)
        hid = jnp.maximum(hid + b1_ref[...], 0.0)
        y = jnp.dot(w2_ref[...], hid, preferred_element_type=jnp.float32)
        return jnp.maximum(y + b2_ref[...], 0.0)

    o1 = conv3x3_instnorm(x, c1t_ref, c1b_ref)
    o2 = blk(o1, b1w1_ref, b1b1_ref, b1w2_ref, b1b2_ref)
    o3 = conv3x3_instnorm(o2, c2t_ref, c2b_ref)
    o4 = blk(o3, b2w1_ref, b2b1_ref, b2w2_ref, b2b2_ref)
    o_ref[...] = (o4 + x).astype(o_ref.dtype)     # residual add


# ----------------------------- host wrapper ----------------------------------
def mis_ins_resblock_forward(x, z, p):
    """MisINSResBlock forward.  x: (N, C, H, W), z: (N, E)."""
    N, C, H, W = x.shape
    E = z.shape[1]
    CE = C + E
    HW = H * W
    f32 = jnp.float32
    eye = jnp.eye(N, dtype=f32)

    def block_diag(wm):            # (a, b) -> (N*a, N*b) == kron(I_N, wm)
        a, b = wm.shape
        return jnp.einsum("nm,ij->nimj", eye, wm.astype(f32)).reshape(N * a, N * b)

    def conv_taps(wc):             # OIHW (C, C, 3, 3) -> (9, N*C, N*C)
        t = jnp.transpose(wc.astype(f32), (2, 3, 0, 1)).reshape(9, C, C)
        return jnp.einsum("nm,tij->tnimj", eye, t).reshape(9, N * C, N * C)

    def tile_bias(b):              # (K,) -> (N*K, 1)
        return jnp.tile(b.astype(f32), N).reshape(N * b.shape[0], 1)

    def blk_w1_and_bias(w1, b1):   # fold W1[:, C:] @ z into the first 1x1 bias
        w1m = w1.reshape(CE, CE).astype(f32)
        w1a = block_diag(w1m[:, :C])                      # (N*CE, N*C)
        zproj = z.astype(f32) @ w1m[:, C:].T              # (N, CE)
        b1z = (b1.astype(f32)[None, :] + zproj).reshape(N * CE, 1)
        return w1a, b1z

    c1t = conv_taps(p["conv1_w"]); c1b = tile_bias(p["conv1_b"])
    c2t = conv_taps(p["conv2_w"]); c2b = tile_bias(p["conv2_b"])
    b1w1, b1b1 = blk_w1_and_bias(p["blk1_w1"], p["blk1_b1"])
    b1w2 = block_diag(p["blk1_w2"].reshape(C, CE)); b1b2 = tile_bias(p["blk1_b2"])
    b2w1, b2b1 = blk_w1_and_bias(p["blk2_w1"], p["blk2_b1"])
    b2w2 = block_diag(p["blk2_w2"].reshape(C, CE)); b2b2 = tile_bias(p["blk2_b2"])

    # Reflection-border blend masks over the flattened (row-major) spatial axis.
    pos = jnp.arange(HW, dtype=jnp.int32)
    masks = jnp.stack([
        (pos < W).astype(f32),               # first row   (y == 0)
        (pos >= (H - 1) * W).astype(f32),    # last row    (y == H-1)
        (pos % W == 0).astype(f32),          # first col   (x == 0)
        (pos % W == W - 1).astype(f32),      # last col    (x == W-1)
    ], axis=0)                               # (4, HW)

    x2d = x.reshape(N * C, HW).astype(f32)

    vmem = pl.BlockSpec(memory_space=pltpu.MemorySpace.VMEM)
    out2d = pl.pallas_call(
        functools.partial(_fused_kernel, h=H, w=W),
        out_shape=jax.ShapeDtypeStruct((N * C, HW), x.dtype),
        in_specs=[vmem] * 14,
        out_specs=vmem,
    )(x2d, masks, c1t, c1b, c2t, c2b,
      b1w1, b1b1, b1w2, b1b2, b2w1, b2b1, b2w2, b2b2)
    return out2d.reshape(N, C, H, W)


# ----------------------------- pure-JAX reference -----------------------------
def ref_forward(x, z, p):
    def conv(xx, w, b):
        y = jax.lax.conv_general_dilated(
            xx, w, (1, 1), "VALID", dimension_numbers=("NCHW", "OIHW", "NCHW"))
        return y + b[None, :, None, None]

    def inorm(xx):
        m = xx.mean(axis=(2, 3), keepdims=True)
        v = ((xx - m) ** 2).mean(axis=(2, 3), keepdims=True)
        return (xx - m) / jnp.sqrt(v + 1e-5)

    pad = lambda xx: jnp.pad(xx, ((0, 0), (0, 0), (1, 1), (1, 1)), mode="reflect")
    N, C, H, W = x.shape
    z_exp = jnp.broadcast_to(z[:, :, None, None], (N, z.shape[1], H, W))
    o1 = inorm(conv(pad(x), p["conv1_w"], p["conv1_b"]))
    t = jax.nn.relu(conv(jnp.concatenate([o1, z_exp], axis=1), p["blk1_w1"], p["blk1_b1"]))
    o2 = jax.nn.relu(conv(t, p["blk1_w2"], p["blk1_b2"]))
    o3 = inorm(conv(pad(o2), p["conv2_w"], p["conv2_b"]))
    t = jax.nn.relu(conv(jnp.concatenate([o3, z_exp], axis=1), p["blk2_w1"], p["blk2_b1"]))
    out = jax.nn.relu(conv(t, p["blk2_w2"], p["blk2_b2"]))
    return out + x


if __name__ == "__main__":
    dim, dim_extra, N, H, W = 4, 4, 2, 16, 16
    key = jax.random.PRNGKey(0)
    ks = jax.random.split(key, 14)
    std = 0.02  # gaussian_weights_init: Conv weights ~ N(0, 0.02)
    p = {
        "conv1_w": std * jax.random.normal(ks[0], (dim, dim, 3, 3), jnp.float32),
        "conv1_b": std * jax.random.normal(ks[1], (dim,), jnp.float32),
        "conv2_w": std * jax.random.normal(ks[2], (dim, dim, 3, 3), jnp.float32),
        "conv2_b": std * jax.random.normal(ks[3], (dim,), jnp.float32),
        "blk1_w1": std * jax.random.normal(ks[4], (dim + dim_extra, dim + dim_extra, 1, 1), jnp.float32),
        "blk1_b1": std * jax.random.normal(ks[5], (dim + dim_extra,), jnp.float32),
        "blk1_w2": std * jax.random.normal(ks[6], (dim, dim + dim_extra, 1, 1), jnp.float32),
        "blk1_b2": std * jax.random.normal(ks[7], (dim,), jnp.float32),
        "blk2_w1": std * jax.random.normal(ks[8], (dim + dim_extra, dim + dim_extra, 1, 1), jnp.float32),
        "blk2_b1": std * jax.random.normal(ks[9], (dim + dim_extra,), jnp.float32),
        "blk2_w2": std * jax.random.normal(ks[10], (dim, dim + dim_extra, 1, 1), jnp.float32),
        "blk2_b2": std * jax.random.normal(ks[11], (dim,), jnp.float32),
    }
    x = jax.random.normal(ks[12], (N, dim, H, W), jnp.float32)
    z = jax.random.normal(ks[13], (N, dim_extra), jnp.float32)

    fwd = jax.jit(mis_ins_resblock_forward)
    out = jax.block_until_ready(fwd(x, z, p))
    ref = jax.block_until_ready(ref_forward(x, z, p))
    assert out.shape == (N, dim, H, W)
    max_err = float(jnp.max(jnp.abs(out - ref)))
    assert jnp.allclose(out, ref, atol=5e-4, rtol=5e-4), f"max abs err {max_err}"
    print("KERNEL_OK")
</pallas_src>

<mosaic_0001>
module attributes {stable_mosaic.version = 11 : i64} {
  func.func @_fused_kernel(%arg0: memref<8x256xf32, #tpu.memory_space<vmem>>, %arg1: memref<4x256xf32, #tpu.memory_space<vmem>>, %arg2: memref<9x8x8xf32, #tpu.memory_space<vmem>>, %arg3: memref<8x1xf32, #tpu.memory_space<vmem>>, %arg4: memref<9x8x8xf32, #tpu.memory_space<vmem>>, %arg5: memref<8x1xf32, #tpu.memory_space<vmem>>, %arg6: memref<16x8xf32, #tpu.memory_space<vmem>>, %arg7: memref<16x1xf32, #tpu.memory_space<vmem>>, %arg8: memref<8x16xf32, #tpu.memory_space<vmem>>, %arg9: memref<8x1xf32, #tpu.memory_space<vmem>>, %arg10: memref<16x8xf32, #tpu.memory_space<vmem>>, %arg11: memref<16x1xf32, #tpu.memory_space<vmem>>, %arg12: memref<8x16xf32, #tpu.memory_space<vmem>>, %arg13: memref<8x1xf32, #tpu.memory_space<vmem>>, %arg14: memref<8x256xf32, #tpu.memory_space<vmem>>) attributes {dimension_semantics = [], scalar_prefetch = 0 : i64, scratch_operands = 0 : i64, tpu.core_type = #tpu.core_type<tc>} {
    %c0 = arith.constant 0 : index
    %c0_0 = arith.constant 0 : index
    %0 = vector.load %arg0[%c0, %c0_0] : memref<8x256xf32, #tpu.memory_space<vmem>>, vector<8x256xf32>
    %c0_1 = arith.constant 0 : index
    %c0_2 = arith.constant 0 : index
    %1 = vector.load %arg1[%c0_1, %c0_2] : memref<4x256xf32, #tpu.memory_space<vmem>>, vector<4x256xf32>
    %2 = vector.extract_strided_slice %1 {offsets = [0, 0], sizes = [1, 256], strides = [1, 1]} : vector<4x256xf32> to vector<1x256xf32>
    %3 = vector.extract_strided_slice %1 {offsets = [1, 0], sizes = [1, 256], strides = [1, 1]} : vector<4x256xf32> to vector<1x256xf32>
    %4 = vector.extract_strided_slice %1 {offsets = [2, 0], sizes = [1, 256], strides = [1, 1]} : vector<4x256xf32> to vector<1x256xf32>
    %5 = vector.extract_strided_slice %1 {offsets = [3, 0], sizes = [1, 256], strides = [1, 1]} : vector<4x256xf32> to vector<1x256xf32>
    %c16_i32 = arith.constant 16 : i32
    %6 = tpu.dynamic_rotate %0 by %c16_i32 dim 1 : vector<8x256xf32>, i32 -> vector<8x256xf32>
    %c240_i32 = arith.constant 240 : i32
    %7 = tpu.dynamic_rotate %0 by %c240_i32 dim 1 : vector<8x256xf32>, i32 -> vector<8x256xf32>
    %8 = vector.broadcast %2 : vector<1x256xf32> to vector<8x256xf32>
    %9 = arith.mulf %8, %7 : vector<8x256xf32>
    %cst = arith.constant 1.000000e+00 : f32
    %10 = vector.broadcast %cst : f32 to vector<1x256xf32>
    %11 = arith.subf %10, %2 : vector<1x256xf32>
    %12 = vector.broadcast %11 : vector<1x256xf32> to vector<8x256xf32>
    %13 = arith.mulf %12, %6 : vector<8x256xf32>
    %14 = arith.addf %9, %13 : vector<8x256xf32>
    %15 = vector.broadcast %3 : vector<1x256xf32> to vector<8x256xf32>
    %16 = arith.mulf %15, %6 : vector<8x256xf32>
    %cst_3 = arith.constant 1.000000e+00 : f32
    %17 = vector.broadcast %cst_3 : f32 to vector<1x256xf32>
    %18 = arith.subf %17, %3 : vector<1x256xf32>
    %19 = vector.broadcast %18 : vector<1x256xf32> to vector<8x256xf32>
    %20 = arith.mulf %19, %7 : vector<8x256xf32>
    %21 = arith.addf %16, %20 : vector<8x256xf32>
    %cst_4 = arith.constant 0.000000e+00 : f32
    %22 = vector.broadcast %cst_4 : f32 to vector<8x256xf32>
    %c1_i32 = arith.constant 1 : i32
    %23 = tpu.dynamic_rotate %14 by %c1_i32 dim 1 : vector<8x256xf32>, i32 -> vector<8x256xf32>
    %c255_i32 = arith.constant 255 : i32
    %24 = tpu.dynamic_rotate %14 by %c255_i32 dim 1 : vector<8x256xf32>, i32 -> vector<8x256xf32>
    %25 = vector.broadcast %4 : vector<1x256xf32> to vector<8x256xf32>
    %26 = arith.mulf %25, %24 : vector<8x256xf32>
    %cst_5 = arith.constant 1.000000e+00 : f32
    %27 = vector.broadcast %cst_5 : f32 to vector<1x256xf32>
    %28 = arith.subf %27, %4 : vector<1x256xf32>
    %29 = vector.broadcast %28 : vector<1x256xf32> to vector<8x256xf32>
    %30 = arith.mulf %29, %23 : vector<8x256xf32>
    %31 = arith.addf %26, %30 : vector<8x256xf32>
    %32 = vector.broadcast %5 : vector<1x256xf32> to vector<8x256xf32>
    %33 = arith.mulf %32, %23 : vector<8x256xf32>
    %cst_6 = arith.constant 1.000000e+00 : f32
    %34 = vector.broadcast %cst_6 : f32 to vector<1x256xf32>
    %35 = arith.subf %34, %5 : vector<1x256xf32>
    %36 = vector.broadcast %35 : vector<1x256xf32> to vector<8x256xf32>
    %37 = arith.mulf %36, %24 : vector<8x256xf32>
    %38 = arith.addf %33, %37 : vector<8x256xf32>
    %c0_7 = arith.constant 0 : index
    %c0_8 = arith.constant 0 : index
    %c0_9 = arith.constant 0 : index
    %39 = vector.load %arg2[%c0_7, %c0_8, %c0_9] : memref<9x8x8xf32, #tpu.memory_space<vmem>>, vector<1x8x8xf32>
    %40 = vector.shape_cast %39 : vector<1x8x8xf32> to vector<8x8xf32>
    %cst_10 = arith.constant dense<0.000000e+00> : vector<8x256xf32>
    %41 = tpu.matmul %40, %31, %cst_10 {dimension_numbers = #tpu.dot_dimension_numbers<[1], [0], [0], [1], [0, 0, 1, 1], [], []>} : vector<8x8xf32>, vector<8x256xf32>, vector<8x256xf32> -> vector<8x256xf32>
    %42 = arith.addf %22, %41 : vector<8x256xf32>
    %c1 = arith.constant 1 : index
    %c0_11 = arith.constant 0 : index
    %c0_12 = arith.constant 0 : index
    %43 = vector.load %arg2[%c1, %c0_11, %c0_12] : memref<9x8x8xf32, #tpu.memory_space<vmem>>, vector<1x8x8xf32>
    %44 = vector.shape_cast %43 : vector<1x8x8xf32> to vector<8x8xf32>
    %cst_13 = arith.constant dense<0.000000e+00> : vector<8x256xf32>
    %45 = tpu.matmul %44, %14, %cst_13 {dimension_numbers = #tpu.dot_dimension_numbers<[1], [0], [0], [1], [0, 0, 1, 1], [], []>} : vector<8x8xf32>, vector<8x256xf32>, vector<8x256xf32> -> vector<8x256xf32>
    %46 = arith.addf %42, %45 : vector<8x256xf32>
    %c2 = arith.constant 2 : index
    %c0_14 = arith.constant 0 : index
    %c0_15 = arith.constant 0 : index
    %47 = vector.load %arg2[%c2, %c0_14, %c0_15] : memref<9x8x8xf32, #tpu.memory_space<vmem>>, vector<1x8x8xf32>
    %48 = vector.shape_cast %47 : vector<1x8x8xf32> to vector<8x8xf32>
    %cst_16 = arith.constant dense<0.000000e+00> : vector<8x256xf32>
    %49 = tpu.matmul %48, %38, %cst_16 {dimension_numbers = #tpu.dot_dimension_numbers<[1], [0], [0], [1], [0, 0, 1, 1], [], []>} : vector<8x8xf32>, vector<8x256xf32>, vector<8x256xf32> -> vector<8x256xf32>
    %50 = arith.addf %46, %49 : vector<8x256xf32>
    %c1_i32_17 = arith.constant 1 : i32
    %51 = tpu.dynamic_rotate %0 by %c1_i32_17 dim 1 : vector<8x256xf32>, i32 -> vector<8x256xf32>
    %c255_i32_18 = arith.constant 255 : i32
    %52 = tpu.dynamic_rotate %0 by %c255_i32_18 dim 1 : vector<8x256xf32>, i32 -> vector<8x256xf32>
    %53 = vector.broadcast %4 : vector<1x256xf32> to vector<8x256xf32>
    %54 = arith.mulf %53, %52 : vector<8x256xf32>
    %cst_19 = arith.constant 1.000000e+00 : f32
    %55 = vector.broadcast %cst_19 : f32 to vector<1x256xf32>
    %56 = arith.subf %55, %4 : vector<1x256xf32>
    %57 = vector.broadcast %56 : vector<1x256xf32> to vector<8x256xf32>
    %58 = arith.mulf %57, %51 : vector<8x256xf32>
    %59 = arith.addf %54, %58 : vector<8x256xf32>
    %60 = vector.broadcast %5 : vector<1x256xf32> to vector<8x256xf32>
    %61 = arith.mulf %60, %51 : vector<8x256xf32>
    %cst_20 = arith.constant 1.000000e+00 : f32
    %62 = vector.broadcast %cst_20 : f32 to vector<1x256xf32>
    %63 = arith.subf %62, %5 : vector<1x256xf32>
    %64 = vector.broadcast %63 : vector<1x256xf32> to vector<8x256xf32>
    %65 = arith.mulf %64, %52 : vector<8x256xf32>
    %66 = arith.addf %61, %65 : vector<8x256xf32>
    %c3 = arith.constant 3 : index
    %c0_21 = arith.constant 0 : index
    %c0_22 = arith.constant 0 : index
    %67 = vector.load %arg2[%c3, %c0_21, %c0_22] : memref<9x8x8xf32, #tpu.memory_space<vmem>>, vector<1x8x8xf32>
    %68 = vector.shape_cast %67 : vector<1x8x8xf32> to vector<8x8xf32>
    %cst_23 = arith.constant dense<0.000000e+00> : vector<8x256xf32>
    %69 = tpu.matmul %68, %59, %cst_23 {dimension_numbers = #tpu.dot_dimension_numbers<[1], [0], [0], [1], [0, 0, 1, 1], [], []>} : vector<8x8xf32>, vector<8x256xf32>, vector<8x256xf32> -> vector<8x256xf32>
    %70 = arith.addf %50, %69 : vector<8x256xf32>
    %c4 = arith.constant 4 : index
    %c0_24 = arith.constant 0 : index
    %c0_25 = arith.constant 0 : index
    %71 = vector.load %arg2[%c4, %c0_24, %c0_25] : memref<9x8x8xf32, #tpu.memory_space<vmem>>, vector<1x8x8xf32>
    %72 = vector.shape_cast %71 : vector<1x8x8xf32> to vector<8x8xf32>
    %cst_26 = arith.constant dense<0.000000e+00> : vector<8x256xf32>
    %73 = tpu.matmul %72, %0, %cst_26 {dimension_numbers = #tpu.dot_dimension_numbers<[1], [0], [0], [1], [0, 0, 1, 1], [], []>} : vector<8x8xf32>, vector<8x256xf32>, vector<8x256xf32> -> vector<8x256xf32>
    %74 = arith.addf %70, %73 : vector<8x256xf32>
    %c5 = arith.constant 5 : index
    %c0_27 = arith.constant 0 : index
    %c0_28 = arith.constant 0 : index
    %75 = vector.load %arg2[%c5, %c0_27, %c0_28] : memref<9x8x8xf32, #tpu.memory_space<vmem>>, vector<1x8x8xf32>
    %76 = vector.shape_cast %75 : vector<1x8x8xf32> to vector<8x8xf32>
    %cst_29 = arith.constant dense<0.000000e+00> : vector<8x256xf32>
    %77 = tpu.matmul %76, %66, %cst_29 {dimension_numbers = #tpu.dot_dimension_numbers<[1], [0], [0], [1], [0, 0, 1, 1], [], []>} : vector<8x8xf32>, vector<8x256xf32>, vector<8x256xf32> -> vector<8x256xf32>
    %78 = arith.addf %74, %77 : vector<8x256xf32>
    %c1_i32_30 = arith.constant 1 : i32
    %79 = tpu.dynamic_rotate %21 by %c1_i32_30 dim 1 : vector<8x256xf32>, i32 -> vector<8x256xf32>
    %c255_i32_31 = arith.constant 255 : i32
    %80 = tpu.dynamic_rotate %21 by %c255_i32_31 dim 1 : vector<8x256xf32>, i32 -> vector<8x256xf32>
    %81 = vector.broadcast %4 : vector<1x256xf32> to vector<8x256xf32>
    %82 = arith.mulf %81, %80 : vector<8x256xf32>
    %cst_32 = arith.constant 1.000000e+00 : f32
    %83 = vector.broadcast %cst_32 : f32 to vector<1x256xf32>
    %84 = arith.subf %83, %4 : vector<1x256xf32>
    %85 = vector.broadcast %84 : vector<1x256xf32> to vector<8x256xf32>
    %86 = arith.mulf %85, %79 : vector<8x256xf32>
    %87 = arith.addf %82, %86 : vector<8x256xf32>
    %88 = vector.broadcast %5 : vector<1x256xf32> to vector<8x256xf32>
    %89 = arith.mulf %88, %79 : vector<8x256xf32>
    %cst_33 = arith.constant 1.000000e+00 : f32
    %90 = vector.broadcast %cst_33 : f32 to vector<1x256xf32>
    %91 = arith.subf %90, %5 : vector<1x256xf32>
    %92 = vector.broadcast %91 : vector<1x256xf32> to vector<8x256xf32>
    %93 = arith.mulf %92, %80 : vector<8x256xf32>
    %94 = arith.addf %89, %93 : vector<8x256xf32>
    %c6 = arith.constant 6 : index
    %c0_34 = arith.constant 0 : index
    %c0_35 = arith.constant 0 : index
    %95 = vector.load %arg2[%c6, %c0_34, %c0_35] : memref<9x8x8xf32, #tpu.memory_space<vmem>>, vector<1x8x8xf32>
    %96 = vector.shape_cast %95 : vector<1x8x8xf32> to vector<8x8xf32>
    %cst_36 = arith.constant dense<0.000000e+00> : vector<8x256xf32>
    %97 = tpu.matmul %96, %87, %cst_36 {dimension_numbers = #tpu.dot_dimension_numbers<[1], [0], [0], [1], [0, 0, 1, 1], [], []>} : vector<8x8xf32>, vector<8x256xf32>, vector<8x256xf32> -> vector<8x256xf32>
    %98 = arith.addf %78, %97 : vector<8x256xf32>
    %c7 = arith.constant 7 : index
    %c0_37 = arith.constant 0 : index
    %c0_38 = arith.constant 0 : index
    %99 = vector.load %arg2[%c7, %c0_37, %c0_38] : memref<9x8x8xf32, #tpu.memory_space<vmem>>, vector<1x8x8xf32>
    %100 = vector.shape_cast %99 : vector<1x8x8xf32> to vector<8x8xf32>
    %cst_39 = arith.constant dense<0.000000e+00> : vector<8x256xf32>
    %101 = tpu.matmul %100, %21, %cst_39 {dimension_numbers = #tpu.dot_dimension_numbers<[1], [0], [0], [1], [0, 0, 1, 1], [], []>} : vector<8x8xf32>, vector<8x256xf32>, vector<8x256xf32> -> vector<8x256xf32>
    %102 = arith.addf %98, %101 : vector<8x256xf32>
    %c8 = arith.constant 8 : index
    %c0_40 = arith.constant 0 : index
    %c0_41 = arith.constant 0 : index
    %103 = vector.load %arg2[%c8, %c0_40, %c0_41] : memref<9x8x8xf32, #tpu.memory_space<vmem>>, vector<1x8x8xf32>
    %104 = vector.shape_cast %103 : vector<1x8x8xf32> to vector<8x8xf32>
    %cst_42 = arith.constant dense<0.000000e+00> : vector<8x256xf32>
    %105 = tpu.matmul %104, %94, %cst_42 {dimension_numbers = #tpu.dot_dimension_numbers<[1], [0], [0], [1], [0, 0, 1, 1], [], []>} : vector<8x8xf32>, vector<8x256xf32>, vector<8x256xf32> -> vector<8x256xf32>
    %106 = arith.addf %102, %105 : vector<8x256xf32>
    %c0_43 = arith.constant 0 : index
    %c0_44 = arith.constant 0 : index
    %107 = vector.load %arg3[%c0_43, %c0_44] : memref<8x1xf32, #tpu.memory_space<vmem>>, vector<8x1xf32>
    %108 = vector.broadcast %107 : vector<8x1xf32> to vector<8x256xf32>
    %109 = arith.addf %106, %108 : vector<8x256xf32>
    %cst_45 = arith.constant dense<0.000000e+00> : vector<8xf32>
    %110 = vector.multi_reduction <add>, %109, %cst_45 [1] : vector<8x256xf32> to vector<8xf32>
    %111 = vector.shape_cast %110 : vector<8xf32> to vector<8x1xf32>
    %cst_46 = arith.constant 2.560000e+02 : f32
    %112 = vector.broadcast %cst_46 : f32 to vector<8x1xf32>
    %113 = arith.divf %111, %112 : vector<8x1xf32>
    %114 = vector.broadcast %113 : vector<8x1xf32> to vector<8x256xf32>
    %115 = arith.subf %109, %114 : vector<8x256xf32>
    %116 = arith.mulf %115, %115 : vector<8x256xf32>
    %cst_47 = arith.constant dense<0.000000e+00> : vector<8xf32>
    %117 = vector.multi_reduction <add>, %116, %cst_47 [1] : vector<8x256xf32> to vector<8xf32>
    %118 = vector.shape_cast %117 : vector<8xf32> to vector<8x1xf32>
    %cst_48 = arith.constant 2.560000e+02 : f32
    %119 = vector.broadcast %cst_48 : f32 to vector<8x1xf32>
    %120 = arith.divf %118, %119 : vector<8x1xf32>
    %cst_49 = arith.constant 9.99999974E-6 : f32
    %121 = vector.broadcast %cst_49 : f32 to vector<8x1xf32>
    %122 = arith.addf %120, %121 : vector<8x1xf32>
    %123 = math.rsqrt %122 : vector<8x1xf32>
    %124 = vector.broadcast %123 : vector<8x1xf32> to vector<8x256xf32>
    %125 = arith.mulf %115, %124 : vector<8x256xf32>
    %c0_50 = arith.constant 0 : index
    %c0_51 = arith.constant 0 : index
    %126 = vector.load %arg6[%c0_50, %c0_51] : memref<16x8xf32, #tpu.memory_space<vmem>>, vector<16x8xf32>
    %cst_52 = arith.constant dense<0.000000e+00> : vector<16x256xf32>
    %127 = tpu.matmul %126, %125, %cst_52 {dimension_numbers = #tpu.dot_dimension_numbers<[1], [0], [0], [1], [0, 0, 1, 1], [], []>} : vector<16x8xf32>, vector<8x256xf32>, vector<16x256xf32> -> vector<16x256xf32>
    %c0_53 = arith.constant 0 : index
    %c0_54 = arith.constant 0 : index
    %128 = vector.load %arg7[%c0_53, %c0_54] : memref<16x1xf32, #tpu.memory_space<vmem>>, vector<16x1xf32>
    %129 = vector.broadcast %128 : vector<16x1xf32> to vector<16x256xf32>
    %130 = arith.addf %127, %129 : vector<16x256xf32>
    %cst_55 = arith.constant 0.000000e+00 : f32
    %131 = vector.broadcast %cst_55 : f32 to vector<16x256xf32>
    %132 = arith.maximumf %130, %131 : vector<16x256xf32>
    %c0_56 = arith.constant 0 : index
    %c0_57 = arith.constant 0 : index
    %133 = vector.load %arg8[%c0_56, %c0_57] : memref<8x16xf32, #tpu.memory_space<vmem>>, vector<8x16xf32>
    %cst_58 = arith.constant dense<0.000000e+00> : vector<8x256xf32>
    %134 = tpu.matmul %133, %132, %cst_58 {dimension_numbers = #tpu.dot_dimension_numbers<[1], [0], [0], [1], [0, 0, 1, 1], [], []>} : vector<8x16xf32>, vector<16x256xf32>, vector<8x256xf32> -> vector<8x256xf32>
    %c0_59 = arith.constant 0 : index
    %c0_60 = arith.constant 0 : index
    %135 = vector.load %arg9[%c0_59, %c0_60] : memref<8x1xf32, #tpu.memory_space<vmem>>, vector<8x1xf32>
    %136 = vector.broadcast %135 : vector<8x1xf32> to vector<8x256xf32>
    %137 = arith.addf %134, %136 : vector<8x256xf32>
    %cst_61 = arith.constant 0.000000e+00 : f32
    %138 = vector.broadcast %cst_61 : f32 to vector<8x256xf32>
    %139 = arith.maximumf %137, %138 : vector<8x256xf32>
    %c16_i32_62 = arith.constant 16 : i32
    %140 = tpu.dynamic_rotate %139 by %c16_i32_62 dim 1 : vector<8x256xf32>, i32 -> vector<8x256xf32>
    %c240_i32_63 = arith.constant 240 : i32
    %141 = tpu.dynamic_rotate %139 by %c240_i32_63 dim 1 : vector<8x256xf32>, i32 -> vector<8x256xf32>
    %142 = vector.broadcast %2 : vector<1x256xf32> to vector<8x256xf32>
    %143 = arith.mulf %142, %141 : vector<8x256xf32>
    %cst_64 = arith.constant 1.000000e+00 : f32
    %144 = vector.broadcast %cst_64 : f32 to vector<1x256xf32>
    %145 = arith.subf %144, %2 : vector<1x256xf32>
    %146 = vector.broadcast %145 : vector<1x256xf32> to vector<8x256xf32>
    %147 = arith.mulf %146, %140 : vector<8x256xf32>
    %148 = arith.addf %143, %147 : vector<8x256xf32>
    %149 = vector.broadcast %3 : vector<1x256xf32> to vector<8x256xf32>
    %150 = arith.mulf %149, %140 : vector<8x256xf32>
    %cst_65 = arith.constant 1.000000e+00 : f32
    %151 = vector.broadcast %cst_65 : f32 to vector<1x256xf32>
    %152 = arith.subf %151, %3 : vector<1x256xf32>
    %153 = vector.broadcast %152 : vector<1x256xf32> to vector<8x256xf32>
    %154 = arith.mulf %153, %141 : vector<8x256xf32>
    %155 = arith.addf %150, %154 : vector<8x256xf32>
    %cst_66 = arith.constant 0.000000e+00 : f32
    %156 = vector.broadcast %cst_66 : f32 to vector<8x256xf32>
    %c1_i32_67 = arith.constant 1 : i32
    %157 = tpu.dynamic_rotate %148 by %c1_i32_67 dim 1 : vector<8x256xf32>, i32 -> vector<8x256xf32>
    %c255_i32_68 = arith.constant 255 : i32
    %158 = tpu.dynamic_rotate %148 by %c255_i32_68 dim 1 : vector<8x256xf32>, i32 -> vector<8x256xf32>
    %159 = vector.broadcast %4 : vector<1x256xf32> to vector<8x256xf32>
    %160 = arith.mulf %159, %158 : vector<8x256xf32>
    %cst_69 = arith.constant 1.000000e+00 : f32
    %161 = vector.broadcast %cst_69 : f32 to vector<1x256xf32>
    %162 = arith.subf %161, %4 : vector<1x256xf32>
    %163 = vector.broadcast %162 : vector<1x256xf32> to vector<8x256xf32>
    %164 = arith.mulf %163, %157 : vector<8x256xf32>
    %165 = arith.addf %160, %164 : vector<8x256xf32>
    %166 = vector.broadcast %5 : vector<1x256xf32> to vector<8x256xf32>
    %167 = arith.mulf %166, %157 : vector<8x256xf32>
    %cst_70 = arith.constant 1.000000e+00 : f32
    %168 = vector.broadcast %cst_70 : f32 to vector<1x256xf32>
    %169 = arith.subf %168, %5 : vector<1x256xf32>
    %170 = vector.broadcast %169 : vector<1x256xf32> to vector<8x256xf32>
    %171 = arith.mulf %170, %158 : vector<8x256xf32>
    %172 = arith.addf %167, %171 : vector<8x256xf32>
    %c0_71 = arith.constant 0 : index
    %c0_72 = arith.constant 0 : index
    %c0_73 = arith.constant 0 : index
    %173 = vector.load %arg4[%c0_71, %c0_72, %c0_73] : memref<9x8x8xf32, #tpu.memory_space<vmem>>, vector<1x8x8xf32>
    %174 = vector.shape_cast %173 : vector<1x8x8xf32> to vector<8x8xf32>
    %cst_74 = arith.constant dense<0.000000e+00> : vector<8x256xf32>
    %175 = tpu.matmul %174, %165, %cst_74 {dimension_numbers = #tpu.dot_dimension_numbers<[1], [0], [0], [1], [0, 0, 1, 1], [], []>} : vector<8x8xf32>, vector<8x256xf32>, vector<8x256xf32> -> vector<8x256xf32>
    %176 = arith.addf %156, %175 : vector<8x256xf32>
    %c1_75 = arith.constant 1 : index
    %c0_76 = arith.constant 0 : index
    %c0_77 = arith.constant 0 : index
    %177 = vector.load %arg4[%c1_75, %c0_76, %c0_77] : memref<9x8x8xf32, #tpu.memory_space<vmem>>, vector<1x8x8xf32>
    %178 = vector.shape_cast %177 : vector<1x8x8xf32> to vector<8x8xf32>
    %cst_78 = arith.constant dense<0.000000e+00> : vector<8x256xf32>
    %179 = tpu.matmul %178, %148, %cst_78 {dimension_numbers = #tpu.dot_dimension_numbers<[1], [0], [0], [1], [0, 0, 1, 1], [], []>} : vector<8x8xf32>, vector<8x256xf32>, vector<8x256xf32> -> vector<8x256xf32>
    %180 = arith.addf %176, %179 : vector<8x256xf32>
    %c2_79 = arith.constant 2 : index
    %c0_80 = arith.constant 0 : index
    %c0_81 = arith.constant 0 : index
    %181 = vector.load %arg4[%c2_79, %c0_80, %c0_81] : memref<9x8x8xf32, #tpu.memory_space<vmem>>, vector<1x8x8xf32>
    %182 = vector.shape_cast %181 : vector<1x8x8xf32> to vector<8x8xf32>
    %cst_82 = arith.constant dense<0.000000e+00> : vector<8x256xf32>
    %183 = tpu.matmul %182, %172, %cst_82 {dimension_numbers = #tpu.dot_dimension_numbers<[1], [0], [0], [1], [0, 0, 1, 1], [], []>} : vector<8x8xf32>, vector<8x256xf32>, vector<8x256xf32> -> vector<8x256xf32>
    %184 = arith.addf %180, %183 : vector<8x256xf32>
    %c1_i32_83 = arith.constant 1 : i32
    %185 = tpu.dynamic_rotate %139 by %c1_i32_83 dim 1 : vector<8x256xf32>, i32 -> vector<8x256xf32>
    %c255_i32_84 = arith.constant 255 : i32
    %186 = tpu.dynamic_rotate %139 by %c255_i32_84 dim 1 : vector<8x256xf32>, i32 -> vector<8x256xf32>
    %187 = vector.broadcast %4 : vector<1x256xf32> to vector<8x256xf32>
    %188 = arith.mulf %187, %186 : vector<8x256xf32>
    %cst_85 = arith.constant 1.000000e+00 : f32
    %189 = vector.broadcast %cst_85 : f32 to vector<1x256xf32>
    %190 = arith.subf %189, %4 : vector<1x256xf32>
    %191 = vector.broadcast %190 : vector<1x256xf32> to vector<8x256xf32>
    %192 = arith.mulf %191, %185 : vector<8x256xf32>
    %193 = arith.addf %188, %192 : vector<8x256xf32>
    %194 = vector.broadcast %5 : vector<1x256xf32> to vector<8x256xf32>
    %195 = arith.mulf %194, %185 : vector<8x256xf32>
    %cst_86 = arith.constant 1.000000e+00 : f32
    %196 = vector.broadcast %cst_86 : f32 to vector<1x256xf32>
    %197 = arith.subf %196, %5 : vector<1x256xf32>
    %198 = vector.broadcast %197 : vector<1x256xf32> to vector<8x256xf32>
    %199 = arith.mulf %198, %186 : vector<8x256xf32>
    %200 = arith.addf %195, %199 : vector<8x256xf32>
    %c3_87 = arith.constant 3 : index
    %c0_88 = arith.constant 0 : index
    %c0_89 = arith.constant 0 : index
    %201 = vector.load %arg4[%c3_87, %c0_88, %c0_89] : memref<9x8x8xf32, #tpu.memory_space<vmem>>, vector<1x8x8xf32>
    %202 = vector.shape_cast %201 : vector<1x8x8xf32> to vector<8x8xf32>
    %cst_90 = arith.constant dense<0.000000e+00> : vector<8x256xf32>
    %203 = tpu.matmul %202, %193, %cst_90 {dimension_numbers = #tpu.dot_dimension_numbers<[1], [0], [0], [1], [0, 0, 1, 1], [], []>} : vector<8x8xf32>, vector<8x256xf32>, vector<8x256xf32> -> vector<8x256xf32>
    %204 = arith.addf %184, %203 : vector<8x256xf32>
    %c4_91 = arith.constant 4 : index
    %c0_92 = arith.constant 0 : index
    %c0_93 = arith.constant 0 : index
    %205 = vector.load %arg4[%c4_91, %c0_92, %c0_93] : memref<9x8x8xf32, #tpu.memory_space<vmem>>, vector<1x8x8xf32>
    %206 = vector.shape_cast %205 : vector<1x8x8xf32> to vector<8x8xf32>
    %cst_94 = arith.constant dense<0.000000e+00> : vector<8x256xf32>
    %207 = tpu.matmul %206, %139, %cst_94 {dimension_numbers = #tpu.dot_dimension_numbers<[1], [0], [0], [1], [0, 0, 1, 1], [], []>} : vector<8x8xf32>, vector<8x256xf32>, vector<8x256xf32> -> vector<8x256xf32>
    %208 = arith.addf %204, %207 : vector<8x256xf32>
    %c5_95 = arith.constant 5 : index
    %c0_96 = arith.constant 0 : index
    %c0_97 = arith.constant 0 : index
    %209 = vector.load %arg4[%c5_95, %c0_96, %c0_97] : memref<9x8x8xf32, #tpu.memory_space<vmem>>, vector<1x8x8xf32>
    %210 = vector.shape_cast %209 : vector<1x8x8xf32> to vector<8x8xf32>
    %cst_98 = arith.constant dense<0.000000e+00> : vector<8x256xf32>
    %211 = tpu.matmul %210, %200, %cst_98 {dimension_numbers = #tpu.dot_dimension_numbers<[1], [0], [0], [1], [0, 0, 1, 1], [], []>} : vector<8x8xf32>, vector<8x256xf32>, vector<8x256xf32> -> vector<8x256xf32>
    %212 = arith.addf %208, %211 : vector<8x256xf32>
    %c1_i32_99 = arith.constant 1 : i32
    %213 = tpu.dynamic_rotate %155 by %c1_i32_99 dim 1 : vector<8x256xf32>, i32 -> vector<8x256xf32>
    %c255_i32_100 = arith.constant 255 : i32
    %214 = tpu.dynamic_rotate %155 by %c255_i32_100 dim 1 : vector<8x256xf32>, i32 -> vector<8x256xf32>
    %215 = vector.broadcast %4 : vector<1x256xf32> to vector<8x256xf32>
    %216 = arith.mulf %215, %214 : vector<8x256xf32>
    %cst_101 = arith.constant 1.000000e+00 : f32
    %217 = vector.broadcast %cst_101 : f32 to vector<1x256xf32>
    %218 = arith.subf %217, %4 : vector<1x256xf32>
    %219 = vector.broadcast %218 : vector<1x256xf32> to vector<8x256xf32>
    %220 = arith.mulf %219, %213 : vector<8x256xf32>
    %221 = arith.addf %216, %220 : vector<8x256xf32>
    %222 = vector.broadcast %5 : vector<1x256xf32> to vector<8x256xf32>
    %223 = arith.mulf %222, %213 : vector<8x256xf32>
    %cst_102 = arith.constant 1.000000e+00 : f32
    %224 = vector.broadcast %cst_102 : f32 to vector<1x256xf32>
    %225 = arith.subf %224, %5 : vector<1x256xf32>
    %226 = vector.broadcast %225 : vector<1x256xf32> to vector<8x256xf32>
    %227 = arith.mulf %226, %214 : vector<8x256xf32>
    %228 = arith.addf %223, %227 : vector<8x256xf32>
    %c6_103 = arith.constant 6 : index
    %c0_104 = arith.constant 0 : index
    %c0_105 = arith.constant 0 : index
    %229 = vector.load %arg4[%c6_103, %c0_104, %c0_105] : memref<9x8x8xf32, #tpu.memory_space<vmem>>, vector<1x8x8xf32>
    %230 = vector.shape_cast %229 : vector<1x8x8xf32> to vector<8x8xf32>
    %cst_106 = arith.constant dense<0.000000e+00> : vector<8x256xf32>
    %231 = tpu.matmul %230, %221, %cst_106 {dimension_numbers = #tpu.dot_dimension_numbers<[1], [0], [0], [1], [0, 0, 1, 1], [], []>} : vector<8x8xf32>, vector<8x256xf32>, vector<8x256xf32> -> vector<8x256xf32>
    %232 = arith.addf %212, %231 : vector<8x256xf32>
    %c7_107 = arith.constant 7 : index
    %c0_108 = arith.constant 0 : index
    %c0_109 = arith.constant 0 : index
    %233 = vector.load %arg4[%c7_107, %c0_108, %c0_109] : memref<9x8x8xf32, #tpu.memory_space<vmem>>, vector<1x8x8xf32>
    %234 = vector.shape_cast %233 : vector<1x8x8xf32> to vector<8x8xf32>
    %cst_110 = arith.constant dense<0.000000e+00> : vector<8x256xf32>
    %235 = tpu.matmul %234, %155, %cst_110 {dimension_numbers = #tpu.dot_dimension_numbers<[1], [0], [0], [1], [0, 0, 1, 1], [], []>} : vector<8x8xf32>, vector<8x256xf32>, vector<8x256xf32> -> vector<8x256xf32>
    %236 = arith.addf %232, %235 : vector<8x256xf32>
    %c8_111 = arith.constant 8 : index
    %c0_112 = arith.constant 0 : index
    %c0_113 = arith.constant 0 : index
    %237 = vector.load %arg4[%c8_111, %c0_112, %c0_113] : memref<9x8x8xf32, #tpu.memory_space<vmem>>, vector<1x8x8xf32>
    %238 = vector.shape_cast %237 : vector<1x8x8xf32> to vector<8x8xf32>
    %cst_114 = arith.constant dense<0.000000e+00> : vector<8x256xf32>
    %239 = tpu.matmul %238, %228, %cst_114 {dimension_numbers = #tpu.dot_dimension_numbers<[1], [0], [0], [1], [0, 0, 1, 1], [], []>} : vector<8x8xf32>, vector<8x256xf32>, vector<8x256xf32> -> vector<8x256xf32>
    %240 = arith.addf %236, %239 : vector<8x256xf32>
    %c0_115 = arith.constant 0 : index
    %c0_116 = arith.constant 0 : index
    %241 = vector.load %arg5[%c0_115, %c0_116] : memref<8x1xf32, #tpu.memory_space<vmem>>, vector<8x1xf32>
    %242 = vector.broadcast %241 : vector<8x1xf32> to vector<8x256xf32>
    %243 = arith.addf %240, %242 : vector<8x256xf32>
    %cst_117 = arith.constant dense<0.000000e+00> : vector<8xf32>
    %244 = vector.multi_reduction <add>, %243, %cst_117 [1] : vector<8x256xf32> to vector<8xf32>
    %245 = vector.shape_cast %244 : vector<8xf32> to vector<8x1xf32>
    %cst_118 = arith.constant 2.560000e+02 : f32
    %246 = vector.broadcast %cst_118 : f32 to vector<8x1xf32>
    %247 = arith.divf %245, %246 : vector<8x1xf32>
    %248 = vector.broadcast %247 : vector<8x1xf32> to vector<8x256xf32>
    %249 = arith.subf %243, %248 : vector<8x256xf32>
    %250 = arith.mulf %249, %249 : vector<8x256xf32>
    %cst_119 = arith.constant dense<0.000000e+00> : vector<8xf32>
    %251 = vector.multi_reduction <add>, %250, %cst_119 [1] : vector<8x256xf32> to vector<8xf32>
    %252 = vector.shape_cast %251 : vector<8xf32> to vector<8x1xf32>
    %cst_120 = arith.constant 2.560000e+02 : f32
    %253 = vector.broadcast %cst_120 : f32 to vector<8x1xf32>
    %254 = arith.divf %252, %253 : vector<8x1xf32>
    %cst_121 = arith.constant 9.99999974E-6 : f32
    %255 = vector.broadcast %cst_121 : f32 to vector<8x1xf32>
    %256 = arith.addf %254, %255 : vector<8x1xf32>
    %257 = math.rsqrt %256 : vector<8x1xf32>
    %258 = vector.broadcast %257 : vector<8x1xf32> to vector<8x256xf32>
    %259 = arith.mulf %249, %258 : vector<8x256xf32>
    %c0_122 = arith.constant 0 : index
    %c0_123 = arith.constant 0 : index
    %260 = vector.load %arg10[%c0_122, %c0_123] : memref<16x8xf32, #tpu.memory_space<vmem>>, vector<16x8xf32>
    %cst_124 = arith.constant dense<0.000000e+00> : vector<16x256xf32>
    %261 = tpu.matmul %260, %259, %cst_124 {dimension_numbers = #tpu.dot_dimension_numbers<[1], [0], [0], [1], [0, 0, 1, 1], [], []>} : vector<16x8xf32>, vector<8x256xf32>, vector<16x256xf32> -> vector<16x256xf32>
    %c0_125 = arith.constant 0 : index
    %c0_126 = arith.constant 0 : index
    %262 = vector.load %arg11[%c0_125, %c0_126] : memref<16x1xf32, #tpu.memory_space<vmem>>, vector<16x1xf32>
    %263 = vector.broadcast %262 : vector<16x1xf32> to vector<16x256xf32>
    %264 = arith.addf %261, %263 : vector<16x256xf32>
    %cst_127 = arith.constant 0.000000e+00 : f32
    %265 = vector.broadcast %cst_127 : f32 to vector<16x256xf32>
    %266 = arith.maximumf %264, %265 : vector<16x256xf32>
    %c0_128 = arith.constant 0 : index
    %c0_129 = arith.constant 0 : index
    %267 = vector.load %arg12[%c0_128, %c0_129] : memref<8x16xf32, #tpu.memory_space<vmem>>, vector<8x16xf32>
    %cst_130 = arith.constant dense<0.000000e+00> : vector<8x256xf32>
    %268 = tpu.matmul %267, %266, %cst_130 {dimension_numbers = #tpu.dot_dimension_numbers<[1], [0], [0], [1], [0, 0, 1, 1], [], []>} : vector<8x16xf32>, vector<16x256xf32>, vector<8x256xf32> -> vector<8x256xf32>
    %c0_131 = arith.constant 0 : index
    %c0_132 = arith.constant 0 : index
    %269 = vector.load %arg13[%c0_131, %c0_132] : memref<8x1xf32, #tpu.memory_space<vmem>>, vector<8x1xf32>
    %270 = vector.broadcast %269 : vector<8x1xf32> to vector<8x256xf32>
    %271 = arith.addf %268, %270 : vector<8x256xf32>
    %cst_133 = arith.constant 0.000000e+00 : f32
    %272 = vector.broadcast %cst_133 : f32 to vector<8x256xf32>
    %273 = arith.maximumf %271, %272 : vector<8x256xf32>
    %274 = arith.addf %273, %0 : vector<8x256xf32>
    %c0_134 = arith.constant 0 : index
    %c0_135 = arith.constant 0 : index
    %275 = vector.load %arg14[%c0_134, %c0_135] : memref<8x256xf32, #tpu.memory_space<vmem>>, vector<8x256xf32>
    tpu.vector_store %arg14[%c0_134, %c0_135], %274 {strides = array<i32>} : memref<8x256xf32, #tpu.memory_space<vmem>>, vector<8x256xf32>,
    return
  }
}

</mosaic_0001>

<bundles_post_ra>
// kernel: tile.23
= control target key start
LH: loop header
LB: loop body
LE: loop exit
PB: predicated region body
PF: predicated region fallthrough
CT: control target
= control target key end

     0   :  { %s22_s0 = inlined_call_operand.vmem [shape: f32[4], index: 0, kind: input, shape index: {}]   ;;  %s23_s1 = inlined_call_operand.vmem [shape: f32[2,4], index: 1, kind: output, shape index: {}]  }
   0x1   :  { %v4_v0 = vld [vmem:[%s22_s0] ss:$0 sm:$0xff] }
   0x2   :  { %5 = vst [vmem:[%s23_s1] sm:$0x3] %v4_v0 }

// kernel: tile.0
= control target key start
LH: loop header
LB: loop body
LE: loop exit
PB: predicated region body
PF: predicated region fallthrough
CT: control target
= control target key end

     0   :  { %s34_s8 = smov 125   ;;  %vm7_vm0 = vcmask 7168   ;;  %s35_s11 = smov 126   ;;  %s61_s0 = inlined_call_operand.vmem [shape: f32[2,4], index: 0, kind: input, shape index: {}]   ;;  %s62_s1 = inlined_call_operand.vmem [shape: f32[8,1], index: 1, kind: output, shape index: {}]  }
   0x1   :  { %v4_v0 = vld [vmem:[%s61_s0] sm:$0x3]  ;;  %s33_s0 = smov 127  }
   0x2   :  { %5 = vst [vmem:[#allocation0] sm:$0x3] %v4_v0 }
   0x9   :  { %v9_v1 = vld [vmem:[#allocation0] sm:$0x3]  }
   0xa   :  { %v21_v2 = vld [vmem:[#allocation0] sm:$0x3]   ;;  %10 = vrot.lane.b32.xlu0 %v9_v1, %s33_s0 }
   0xb   :  { %22 = vrot.lane.b32.xlu1 %v21_v2, %s34_s8  ;;  %v6_v3 = vld [vmem:[#allocation0] sm:$0x3]  }
   0xc   :  { %v15_v4 = vld [vmem:[#allocation0] sm:$0x3]   ;;  %8 = vst.msk [vmem:[%s62_s1] ss:$4 sm:$0x3] %vm7_vm0, %v6_v3  }
   0xe   :  { %16 = vrot.lane.b32.xlu0 %v15_v4, %s35_s11 }
  0x7c   :  { %v11_v5 = vpop.permute.xlu0 %10  }
  0x7d   :  { %v23_v6 = vpop.permute.xlu1 %22   ;;  %27 = vst.msk [vmem:[%s62_s1 + $0x1] ss:$4 sm:$0x3] %vm7_vm0, %v11_v5  }
  0x7e   :  { %29 = vst.msk [vmem:[%s62_s1 + $0x3] ss:$4 sm:$0x3] %vm7_vm0, %v23_v6  }
  0x80   :  { %v17_v7 = vpop.permute.xlu0 %16  }
  0x81   :  { %28 = vst.msk [vmem:[%s62_s1 + $0x2] ss:$4 sm:$0x3] %vm7_vm0, %v17_v7  }

// kernel: mis_ins_resblock_forward.1
= control target key start
LH: loop header
LB: loop body
LE: loop exit
PB: predicated region body
PF: predicated region fallthrough
CT: control target
= control target key end

     0   :  { %s2308_s15 = smov 112   ;;  %s2309_s16 = smov 16   ;;  %v54_v2 = vlaneseq  ;;  %v2310_v15 = vmov 0.0   ;;  %vm254_vm2 = vcmask 64512   ;;  %v2313_v49 = vmov 0   ;;  %s2827_s0 = inlined_call_operand.vmem [shape: f32[8,256], index: 0, kind: input, shape index: {}]   ;;  %s2828_s1 = inlined_call_operand.vmem [shape: f32[4,256], index: 1, kind: input, shape index: {}]   ;;  %s2829_s2 = inlined_call_operand.vmem [shape: f32[9,8,8], index: 2, kind: input, shape index: {}]   ;;  %s2830_s3 = inlined_call_operand.vmem [shape: f32[8,1], index: 3, kind: input, shape index: {}]   ;;  %s2831_s7 = inlined_call_operand.vmem [shape: f32[16,1], index: 7, kind: input, shape index: {}]   ;;  %s2832_s9 = inlined_call_operand.vmem [shape: f32[8,1], index: 9, kind: input, shape index: {}]   ;;  %s2833_s6 = inlined_call_operand.vmem [shape: f32[16,8], index: 6, kind: input, shape index: {}]   ;;  %s2834_s8 = inlined_call_operand.vmem [shape: f32[8,16], index: 8, kind: input, shape index: {}]   ;;  %s2835_s4 = inlined_call_operand.vmem [shape: f32[9,8,8], index: 4, kind: input, shape index: {}]   ;;  %s2836_s5 = inlined_call_operand.vmem [shape: f32[8,1], index: 5, kind: input, shape index: {}]   ;;  %s2837_s11 = inlined_call_operand.vmem [shape: f32[16,1], index: 11, kind: input, shape index: {}]   ;;  %s2838_s13 = inlined_call_operand.vmem [shape: f32[8,1], index: 13, kind: input, shape index: {}]   ;;  %s2839_s10 = inlined_call_operand.vmem [shape: f32[16,8], index: 10, kind: input, shape index: {}]   ;;  %s2840_s12 = inlined_call_operand.vmem [shape: f32[8,16], index: 12, kind: input, shape index: {}]   ;;  %s2841_s14 = inlined_call_operand.vmem [shape: f32[8,256], index: 14, kind: output, shape index: {}]  }
   0x1   :  { %v2392_v0 = vld [vmem:[%s2827_s0] sm:$0xff]  ;;  %v2401_v1 = vld [vmem:[%s2827_s0 + $0x8] sm:$0xff]  ;;  %322 = vmatprep.mubr.f32.mxu0 %v2310_v15  ;;  %1106 = vmatprep.mubr.f32.mxu1 %v2310_v15  ;;  %s2311_s0 = smov 1   ;;  %s2312_s22 = smov 127   ;;  %vm1130_vm5 = vcmask 130048  }
   0x2   :  { %59 = vrot.lane.b32.xlu1 %v2392_v0, %s2308_s15  ;;  %50 = vrot.lane.b32.xlu0 %v2392_v0, %s2309_s16  ;;  %v2407_v3 = vshrl.u32 %v54_v2, 7  ;;  %v2412_v4 = vld [vmem:[%s2828_s1] sm:$0xff]  ;;  %v2419_v8 = vand.u32 127, %v54_v2  ;;  %v2216_v34 = vld [vmem:[%s2829_s2 + $0x8] sm:$0xff] }
   0x3   :  { %v2417_v7 = vsub.f32 1.0, %v2412_v4  ;;  %2302 = vset.pattern.permute.xlu0 %v2313_v49  ;;  %v997_v50 = vld [vmem:[%s2830_s3] sm:$0xff]  ;;  %2303 = vset.pattern.permute.xlu1 %v2313_v49 }
   0x4   :  { %v69_v5 = vsub.s32 0, %v2407_v3  ;;  %v73_v6 = vsub.s32 4, %v2407_v3  ;;  %vm63_vm0 = vcmp.lt.s32.totalorder %v2419_v8, 112  ;;  %vm56_vm1 = vcmp.lt.s32.totalorder %v2419_v8, 16 }
   0x5   :  { %v113_v30 = vsub.s32 1, %v2407_v3  ;;  %v117_v31 = vsub.s32 5, %v2407_v3  ;;  %v169_v51 = vsub.s32 2, %v2407_v3  ;;  %v173_v52 = vsub.s32 6, %v2407_v3 }
   0x6   :  { %61 = vrot.lane.b32.xlu1 %v2401_v1, %s2308_s15  ;;  %52 = vrot.lane.b32.xlu0 %v2401_v1, %s2309_s16  ;;  %v70_v9 = vrot.slane %v2412_v4, %v69_v5  ;;  %v74_v10 = vrot.slane %v2412_v4, %v73_v6  ;;  %v92_v11 = vrot.slane %v2417_v7, %v69_v5  ;;  %v215_v53 = vsub.s32 7, %v2407_v3 }
   0x7   :  { %v96_v12 = vrot.slane %v2417_v7, %v73_v6  ;;  %v134_v35 = vrot.slane %v2417_v7, %v113_v30  ;;  %v138_v36 = vrot.slane %v2417_v7, %v117_v31  ;;  %v114_v37 = vrot.slane %v2412_v4, %v113_v30 }
   0x8   :  { %v2428_v16 = vrot.slane %v70_v9, %v69_v5  ;;  %v2430_v17 = vrot.slane %v74_v10, %v69_v5  ;;  %v2433_v18 = vrot.slane %v92_v11, %v69_v5  ;;  %v118_v38 = vrot.slane %v2412_v4, %v117_v31 }
   0x9   :  { %v2435_v19 = vrot.slane %v96_v12, %v69_v5  ;;  %v2464_v39 = vrot.slane %v134_v35, %v113_v30  ;;  %v2466_v40 = vrot.slane %v138_v36, %v113_v30  ;;  %v2468_v41 = vrot.slane %v114_v37, %v113_v30  ;;  %v251_v36 = vld [vmem:[%s2829_s2] sm:$0xff] }
   0xa   :  { %v2470_v42 = vrot.slane %v118_v38, %v113_v30  ;;  %v190_v54 = vrot.slane %v2417_v7, %v169_v51  ;;  %v194_v55 = vrot.slane %v2417_v7, %v173_v52  ;;  %v211_v56 = vsub.s32 3, %v2407_v3 }
   0xb   :  { %v170_v57 = vrot.slane %v2412_v4, %v169_v51  ;;  %v174_v58 = vrot.slane %v2412_v4, %v173_v52  ;;  %v236_v59 = vrot.slane %v2417_v7, %v215_v53  ;;  %vm157_vm3 = vcmp.lt.s32.totalorder %v2419_v8, 1 }
   0xc   :  { %v232_v60 = vrot.slane %v2417_v7, %v211_v56  ;;  %v216_v62 = vrot.slane %v2412_v4, %v215_v53  ;;  %vm164_vm4 = vcmp.lt.s32.totalorder %v2419_v8, 127  ;;  %v2512_v2 = vrot.slane %v190_v54, %v169_v51 }
   0xd   :  { %v2514_v5 = vrot.slane %v194_v55, %v169_v51  ;;  %v212_v3 = vrot.slane %v2412_v4, %v211_v56  ;;  %v2519_v9 = vrot.slane %v170_v57, %v169_v51  ;;  %v2521_v10 = vrot.slane %v174_v58, %v169_v51 }
   0xe   :  { %v2523_v7 = vrot.slane %v236_v59, %v211_v56  ;;  %v2527_v12 = vrot.slane %v232_v60, %v211_v56 }
  0x74   :  { %v60_v13 = vpop.permute.xlu1 %59  ;;  %v51_v14 = vpop.permute.xlu0 %50 }
  0x78   :  { %v62_v20 = vpop.permute.xlu1 %61  ;;  %v53_v21 = vpop.permute.xlu0 %52 }
  0x79   :  { %v64_v22 = vsel %vm63_vm0, %v60_v13, %v62_v20  ;;  %v65_v23 = vsel %vm63_vm0, %v62_v20, %v60_v13  ;;  %v57_v24 = vsel %vm56_vm1, %v51_v14, %v53_v21  ;;  %v58_v25 = vsel %vm56_vm1, %v53_v21, %v51_v14 }
  0x7a   :  { %v85_v26 = vmul.f32 %v2428_v16, %v64_v22  ;;  %v86_v27 = vmul.f32 %v2430_v17, %v65_v23  ;;  %v107_v28 = vmul.f32 %v2433_v18, %v58_v25  ;;  %v108_v29 = vmul.f32 %v2435_v19, %v57_v24 }
  0x7b   :  { %v149_v43 = vmul.f32 %v2464_v39, %v64_v22  ;;  %v150_v44 = vmul.f32 %v2466_v40, %v65_v23  ;;  %v129_v45 = vmul.f32 %v2468_v41, %v58_v25  ;;  %v130_v46 = vmul.f32 %v2470_v42, %v57_v24 }
  0x7c   :  { %v109_v32 = vadd.f32 %v107_v28, %v85_v26  ;;  %v110_v33 = vadd.f32 %v108_v29, %v86_v27  ;;  %v2529_v13 = vrot.slane %v216_v62, %v211_v56  ;;  %v2531_v21 = vrot.slane %v212_v3, %v211_v56  ;;  %v2219_v56 = vld [vmem:[%s2829_s2 + $0x10] sm:$0xff] }
  0x7d   :  { %v2484_v47 = vadd.f32 %v149_v43, %v129_v45  ;;  %v2486_v48 = vadd.f32 %v150_v44, %v130_v46 }
  0x7e   :  { %153 = vrot.lane.b32.xlu0 %v109_v32, %s2311_s0  ;;  %155 = vrot.lane.b32.xlu1 %v110_v33, %s2311_s0 }
  0x7f   :  { %258 = vmatprep.subr.mxu0 %v110_v33 }
  0x80   :  { %259 = vmatpush1.msra.mxu0 %v109_v32 }
  0x81   :  { %2217 = vmatmul.mubr.msk.f32.vlgmr.msra.gmra.mrb[0].mxu0 %vm254_vm2, %v2216_v34 }
  0x82   :  { %160 = vrot.lane.b32.xlu0 %v109_v32, %s2312_s22  ;;  %162 = vrot.lane.b32.xlu1 %v110_v33, %s2312_s22 }
  0x83   :  { %396 = vmatprep.mubr.f32.mxu0 %v2310_v15 }
  0x86   :  { %481 = vrot.lane.b32.xlu0 %v2392_v0, %s2311_s0  ;;  %483 = vrot.lane.b32.xlu1 %v2401_v1, %s2311_s0 }
  0x8a   :  { %487 = vrot.lane.b32.xlu0 %v2392_v0, %s2312_s22  ;;  %489 = vrot.lane.b32.xlu1 %v2401_v1, %s2312_s22 }
  0x8e   :  { %739 = vrot.lane.b32.xlu0 %v2484_v47, %s2311_s0  ;;  %741 = vrot.lane.b32.xlu1 %v2486_v48, %s2311_s0 }
  0x92   :  { %745 = vrot.lane.b32.xlu0 %v2484_v47, %s2312_s22  ;;  %747 = vrot.lane.b32.xlu1 %v2486_v48, %s2312_s22 }
  0x96   :  { %1000 = vperm.xlu0 %2302, %v997_v50  }
  0xf0   :  { %v154_v61 = vpop.permute.xlu0 %153  ;;  %v156_v63 = vpop.permute.xlu1 %155 }
  0xf1   :  { %v159_v6 = vsel %vm157_vm3, %v156_v63, %v154_v61  ;;  %v158_v11 = vsel %vm157_vm3, %v154_v61, %v156_v63  ;;  %v2221_v61 = vld [vmem:[%s2829_s2 + $0x18] sm:$0xff] }
  0xf2   :  { %v205_v4 = vmul.f32 %v2512_v2, %v159_v6  ;;  %v206_v24 = vmul.f32 %v2514_v5, %v158_v11  ;;  %v228_v29 = vmul.f32 %v2529_v13, %v158_v11  ;;  %v227_v34 = vmul.f32 %v2531_v21, %v159_v6 }
  0xf4   :  { %v161_v14 = vpop.permute.xlu0 %160  ;;  %v163_v20 = vpop.permute.xlu1 %162 }
  0xf5   :  { %v165_v22 = vsel %vm164_vm4, %v161_v14, %v163_v20  ;;  %v166_v23 = vsel %vm164_vm4, %v163_v20, %v161_v14 }
  0xf6   :  { %v185_v25 = vmul.f32 %v2519_v9, %v165_v22  ;;  %v186_v26 = vmul.f32 %v2521_v10, %v166_v23  ;;  %v248_v27 = vmul.f32 %v2523_v7, %v166_v23  ;;  %v247_v28 = vmul.f32 %v2527_v12, %v165_v22  ;;  %v2223_v22 = vld [vmem:[%s2829_s2 + $0x20] sm:$0xff] }
  0xf8   :  { %v207_v30 = vadd.f32 %v205_v4, %v185_v25  ;;  %v482_v31 = vpop.permute.xlu0 %481  ;;  %v484_v32 = vpop.permute.xlu1 %483  ;;  %v208_v33 = vadd.f32 %v206_v24, %v186_v26  ;;  %v250_v38 = vadd.f32 %v248_v27, %v228_v29  ;;  %v249_v43 = vadd.f32 %v247_v28, %v227_v34 }
  0xf9   :  { %v485_v35 = vsel %vm157_vm3, %v482_v31, %v484_v32  ;;  %v486_v37 = vsel %vm157_vm3, %v484_v32, %v482_v31 }
  0xfa   :  { %332 = vmatprep.subr.mxu0 %v208_v33  ;;  %v496_v44 = vmul.f32 %v485_v35, %v2514_v5  ;;  %v495_v49 = vmul.f32 %v486_v37, %v2512_v2  ;;  %v500_v59 = vmul.f32 %v485_v35, %v2529_v13  ;;  %v499_v11 = vmul.f32 %v486_v37, %v2531_v21  ;;  %v2227_v33 = vld [vmem:[%s2829_s2 + $0x30] sm:$0xff]  ;;  %v2229_v37 = vld [vmem:[%s2829_s2 + $0x38] sm:$0xff] }
  0xfb   :  { %333 = vmatpush1.msra.mxu0 %v207_v30  ;;  %v2225_v30 = vld [vmem:[%s2829_s2 + $0x28] sm:$0xff] }
  0xfc   :  { %v488_v45 = vpop.permute.xlu0 %487  ;;  %v490_v46 = vpop.permute.xlu1 %489  ;;  %2218 = vmatmul.mubr.msk.f32.vlgmr.msra.gmra.mrb[0].mxu0 %vm254_vm2, %v251_v36  ;;  %408 = vmatprep.subr.mxu0 %v250_v38 }
  0xfd   :  { %v491_v50 = vsel %vm164_vm4, %v488_v45, %v490_v46  ;;  %v492_v51 = vsel %vm164_vm4, %v490_v46, %v488_v45  ;;  %409 = vmatpush1.msra.mxu0 %v249_v43  ;;  %472 = vmatprep.mubr.f32.mxu0 %v2310_v15 }
  0xfe   :  { %v493_v52 = vmul.f32 %v491_v50, %v2519_v9  ;;  %v494_v53 = vmul.f32 %v492_v51, %v2521_v10  ;;  %v502_v60 = vmul.f32 %v492_v51, %v2523_v7  ;;  %v501_v14 = vmul.f32 %v491_v50, %v2527_v12 }
 0x100   :  { %v498_v54 = vadd.f32 %v496_v44, %v494_v53  ;;  %v497_v55 = vadd.f32 %v495_v49, %v493_v52  ;;  %v740_v57 = vpop.permute.xlu0 %739  ;;  %v742_v58 = vpop.permute.xlu1 %741  ;;  %v504_v3 = vadd.f32 %v502_v60, %v500_v59  ;;  %v503_v24 = vadd.f32 %v501_v14, %v499_v11  ;;  %v1024_v59 = vld [vmem:[%s2831_s7] sm:$0xff] }
 0x101   :  { %v743_v20 = vsel %vm157_vm3, %v740_v57, %v742_v58  ;;  %v744_v27 = vsel %vm157_vm3, %v742_v58, %v740_v57  ;;  %v1025_v58 = vld [vmem:[%s2831_s7 + $0x8] sm:$0xff]  ;;  %v1124_v60 = vld [vmem:[%s2832_s9] sm:$0xff] }
 0x102   :  { %510 = vmatprep.subr.mxu0 %v498_v54  ;;  %v754_v23 = vmul.f32 %v743_v20, %v2514_v5  ;;  %v753_v29 = vmul.f32 %v744_v27, %v2512_v2  ;;  %v758_v34 = vmul.f32 %v743_v20, %v2529_v13  ;;  %v1022_v14 = vld [vmem:[%s2833_s6] sm:$0xff]  ;;  %v1023_v20 = vld [vmem:[%s2833_s6 + $0x8] sm:$0xff] }
 0x104   :  { %2220 = vmatmul.mubr.msk.f32.vlgmr.msra.gmra.mrb[0].mxu0 %vm254_vm2, %v2219_v56  ;;  %v746_v62 = vpop.permute.xlu0 %745  ;;  %v748_v63 = vpop.permute.xlu1 %747 }
 0x105   :  { %511 = vmatpush1.msra.mxu0 %v497_v55  ;;  %574 = vmatprep.mubr.f32.mxu0 %v2310_v15  ;;  %v750_v6 = vsel %vm164_vm4, %v748_v63, %v746_v62  ;;  %v749_v25 = vsel %vm164_vm4, %v746_v62, %v748_v63 }
 0x106   :  { %588 = vmatprep.subr.mxu0 %v2401_v1  ;;  %v752_v4 = vmul.f32 %v750_v6, %v2521_v10  ;;  %v751_v28 = vmul.f32 %v749_v25, %v2519_v9  ;;  %v760_v32 = vmul.f32 %v750_v6, %v2523_v7  ;;  %v759_v36 = vmul.f32 %v749_v25, %v2527_v12 }
 0x108   :  { %v756_v26 = vadd.f32 %v754_v23, %v752_v4  ;;  %v755_v31 = vadd.f32 %v753_v29, %v751_v28  ;;  %v762_v35 = vadd.f32 %v760_v32, %v758_v34 }
 0x10c   :  { %2222 = vmatmul.mubr.msk.f32.vlgmr.msra.gmra.mrb[0].mxu0 %vm254_vm2, %v2221_v61 }
 0x10d   :  { %589 = vmatpush1.msra.mxu0 %v2392_v0  ;;  %652 = vmatprep.mubr.f32.mxu0 %v2310_v15 }
 0x10e   :  { %666 = vmatprep.subr.mxu0 %v504_v3 }
 0x114   :  { %2224 = vmatmul.mubr.msk.f32.vlgmr.msra.gmra.mrb[0].mxu0 %vm254_vm2, %v2223_v22 }
 0x115   :  { %667 = vmatpush1.msra.mxu0 %v503_v24  ;;  %730 = vmatprep.mubr.f32.mxu0 %v2310_v15  ;;  %v1001_v43 = vpop.permute.xlu0 %1000 }
 0x116   :  { %768 = vmatprep.subr.mxu0 %v756_v26 }
 0x11c   :  { %2226 = vmatmul.mubr.msk.f32.vlgmr.msra.gmra.mrb[0].mxu0 %vm254_vm2, %v2225_v30 }
 0x11d   :  { %769 = vmatpush1.msra.mxu0 %v755_v31  ;;  %832 = vmatprep.mubr.f32.mxu0 %v2310_v15 }
 0x11e   :  { %846 = vmatprep.subr.mxu0 %v2486_v48  ;;  %v757_v48 = vmul.f32 %v744_v27, %v2531_v21 }
 0x120   :  { %v761_v38 = vadd.f32 %v759_v36, %v757_v48  ;;  %v1123_v48 = vld [vmem:[%s2834_s8] sm:$0xff] }
 0x124   :  { %2228 = vmatmul.mubr.msk.f32.vlgmr.msra.gmra.mrb[0].mxu0 %vm254_vm2, %v2227_v33 }
 0x125   :  { %847 = vmatpush1.msra.mxu0 %v2484_v47  ;;  %910 = vmatprep.mubr.f32.mxu0 %v2310_v15  ;;  %v2231_v47 = vld [vmem:[%s2829_s2 + $0x40] sm:$0xff] }
 0x126   :  { %924 = vmatprep.subr.mxu0 %v762_v35 }
 0x12c   :  { %2230 = vmatmul.mubr.msk.f32.vlgmr.msra.gmra.mrb[0].mxu0 %vm254_vm2, %v2229_v37 }
 0x12d   :  { %925 = vmatpush1.msra.mxu0 %v761_v38  ;;  %988 = vmatprep.mubr.f32.mxu0 %v2310_v15 }
 0x134   :  { %2232 = vmatmul.mubr.msk.f32.vlgmr.msra.gmra.mrb[0].mxu0 %vm254_vm2, %v2231_v47 }
 0x135   :  { %2108 = vmatprep.mubr.f32.mxu0 %v2310_v15 }
 0x207   :  { %v990_v44 = vpop.f32.mrb[0].mxu0 }
 0x208   :  { %v1003_v45 = vadd.f32 %v1001_v43, %v990_v44  ;;  %v992_v46 = vpop.f32.mrb[1].mxu0 }
 0x209   :  { %v1004_v49 = vadd.f32 %v1001_v43, %v992_v46 }
 0x20b   :  { %v1005_v50 = vadd.f32 %v1004_v49, %v1003_v45 }
 0x20d   :  { %1006 = vadd.xlane.f32.xlu1 %v1005_v50 }
 0x21e   :  { %1028 = vperm.xlu1 %2303, %v1024_v59  }
 0x222   :  { %1127 = vperm.xlu1 %2303, %v1124_v60  }
 0x29a   :  { %v1007_v51 = vpop.xlane.xlu1 %1006 }
 0x29b   :  { %v1009_v52 = vmul.f32 0.00390625, %v1007_v51 }
 0x29d   :  { %v1010_v53 = vsub.f32 %v1003_v45, %v1009_v52  ;;  %v1011_v54 = vsub.f32 %v1004_v49, %v1009_v52 }
 0x29e   :  { %v1029_v22 = vpop.permute.xlu1 %1028 }
 0x29f   :  { %v1012_v55 = vmul.f32 %v1010_v53, %v1010_v53  ;;  %v1013_v56 = vmul.f32 %v1011_v54, %v1011_v54 }
 0x2a1   :  { %v1014_v57 = vadd.f32 %v1013_v56, %v1012_v55 }
 0x2a2   :  { %v1128_v37 = vpop.permute.xlu1 %1127 }
 0x2a3   :  { %1015 = vadd.xlane.f32.xlu0 %v1014_v57 }
 0x2b9   :  { %1033 = vperm.xlu0 %2302, %v1025_v58  }
 0x330   :  { %v1016_v61 = vpop.xlane.xlu0 %1015 }
 0x331   :  { %v1017_v62 = vmul.f32 0.00390625, %v1016_v61 }
 0x333   :  { %v1018_v63 = vadd.f32 1e-05, %v1017_v62 }
 0x335   :  { %2304 = vrsqrt.f32 %v1018_v63  ;;  %v2236_v63 = vld [vmem:[%s2835_s4 + $0x8] sm:$0xff] }
 0x338   :  { %v1034_v25 = vpop.permute.xlu0 %1033 }
 0x33f   :  { %v2305_v3 = vpop.eup %2304 }
 0x340   :  { %v1021_v6 = vmul.f32 %v2305_v3, %v1011_v54  ;;  %v1020_v11 = vmul.f32 %v2305_v3, %v1010_v53 }
 0x342   :  { %1042 = vmatprep.subr.mxu1 %v1021_v6 }
 0x343   :  { %1043 = vmatpush1.msra.mxu1 %v1020_v11 }
 0x344   :  { %2233 = vmatmul.mubr.msk.f32.vlgmr.msra.gmra.mrb[0].mxu1 %vm254_vm2, %v1022_v14 }
 0x345   :  { %1112 = vmatprep.mubr.f32.mxu1 %v2310_v15 }
 0x348   :  { %2234 = vmatmul.mubr.msk.f32.gmra.mrb[2].mxu1 %vm254_vm2, %v1023_v20 }
 0x349   :  { %1198 = vmatprep.mubr.f32.mxu1 %v2310_v15 }
 0x417   :  { %v1108_v4 = vpop.f32.mrb[0].mxu1 }
 0x418   :  { %v1110_v23 = vpop.f32.mrb[1].mxu1  ;;  %v1109_v24 = vadd.f32 %v1108_v4, %v1029_v22 }
 0x419   :  { %v1111_v26 = vadd.f32 %v1110_v23, %v1029_v22 }
 0x41a   :  { %v1119_v31 = vmax.f32 %v1109_v24, 0.0 }
 0x41b   :  { %v1114_v27 = vpop.f32.mrb[2].mxu1  ;;  %v1120_v33 = vmax.f32 %v1111_v26, 0.0 }
 0x41c   :  { %v1115_v28 = vadd.f32 %v1114_v27, %v1034_v25  ;;  %v1116_v29 = vpop.f32.mrb[3].mxu1 }
 0x41d   :  { %v1117_v30 = vadd.f32 %v1116_v29, %v1034_v25 }
 0x41e   :  { %v1121_v32 = vmax.f32 %v1115_v28, 0.0 }
 0x41f   :  { %v1122_v34 = vmax.f32 %v1117_v30, 0.0 }
 0x420   :  { %v2258_v35 = vpack.c.bf16 %v1121_v32, %v1119_v31 }
 0x421   :  { %v2256_v36 = vpack.c.bf16 %v1122_v34, %v1120_v33 }
 0x423   :  { %2257 = vmatprep.subr.bf16.mxu1 %v2256_v36 }
 0x424   :  { %2259 = vmatpush1.bf16.msra.mxu1 %v2258_v35  ;;  %v1255_v35 = vld [vmem:[%s2835_s4] sm:$0xff] }
 0x427   :  { %2235 = vmatmul.mubr.msk.f32.vlgmr.msra.gmra.mrb[4].mxu1 %vm1130_vm5, %v1123_v48 }
 0x428   :  { %1325 = vmatprep.mubr.f32.mxu1 %v2310_v15 }
 0x4fa   :  { %v1200_v38 = vpop.f32.mrb[4].mxu1 }
 0x4fb   :  { %v1201_v47 = vadd.f32 %v1200_v38, %v1128_v37  ;;  %v1202_v43 = vpop.f32.mrb[5].mxu1 }
 0x4fc   :  { %v1203_v44 = vadd.f32 %v1202_v43, %v1128_v37 }
 0x4fd   :  { %v2645_v45 = vmax.f32 %v1201_v47, 0.0 }
 0x4fe   :  { %v2647_v46 = vmax.f32 %v1203_v44, 0.0 }
 0x4ff   :  { %1207 = vrot.lane.b32.xlu1 %v2645_v45, %s2309_s16 }
 0x500   :  { %1209 = vrot.lane.b32.xlu0 %v2647_v46, %s2309_s16 }
 0x503   :  { %1213 = vrot.lane.b32.xlu1 %v2645_v45, %s2308_s15 }
 0x504   :  { %1215 = vrot.lane.b32.xlu0 %v2647_v46, %s2308_s15 }
 0x571   :  { %v1208_v49 = vpop.permute.xlu1 %1207 }
 0x572   :  { %v1210_v50 = vpop.permute.xlu0 %1209 }
 0x573   :  { %v1211_v51 = vsel %vm56_vm1, %v1208_v49, %v1210_v50  ;;  %v1212_v52 = vsel %vm56_vm1, %v1210_v50, %v1208_v49 }
 0x574   :  { %v1221_v57 = vmul.f32 %v1212_v52, %v2433_v18  ;;  %v1222_v58 = vmul.f32 %v1211_v51, %v2435_v19  ;;  %v1226_v18 = vmul.f32 %v1211_v51, %v2470_v42  ;;  %v1225_v19 = vmul.f32 %v1212_v52, %v2468_v41 }
 0x575   :  { %v1214_v53 = vpop.permute.xlu1 %1213 }
 0x576   :  { %v1216_v54 = vpop.permute.xlu0 %1215 }
 0x577   :  { %v1217_v55 = vsel %vm63_vm0, %v1214_v53, %v1216_v54  ;;  %v1218_v56 = vsel %vm63_vm0, %v1216_v54, %v1214_v53 }
 0x578   :  { %v1219_v59 = vmul.f32 %v1217_v55, %v2428_v16  ;;  %v1220_v60 = vmul.f32 %v1218_v56, %v2430_v17  ;;  %v1228_v16 = vmul.f32 %v1218_v56, %v2466_v40  ;;  %v1227_v17 = vmul.f32 %v1217_v55, %v2464_v39  ;;  %v2000_v39 = vld [vmem:[%s2836_s5] sm:$0xff]  ;;  %v2239_v55 = vld [vmem:[%s2835_s4 + $0x10] sm:$0xff] }
 0x57a   :  { %v1224_v61 = vadd.f32 %v1222_v58, %v1220_v60  ;;  %v1223_v62 = vadd.f32 %v1221_v57, %v1219_v59  ;;  %v2690_v3 = vadd.f32 %v1228_v16, %v1226_v18  ;;  %v2692_v6 = vadd.f32 %v1227_v17, %v1225_v19  ;;  %v2241_v60 = vld [vmem:[%s2835_s4 + $0x18] sm:$0xff] }
 0x57c   :  { %1233 = vrot.lane.b32.xlu0 %v1224_v61, %s2311_s0  ;;  %1261 = vmatprep.subr.mxu1 %v1224_v61 }
 0x57d   :  { %1231 = vrot.lane.b32.xlu1 %v1223_v62, %s2311_s0  ;;  %1262 = vmatpush1.msra.mxu1 %v1223_v62 }
 0x57e   :  { %2237 = vmatmul.mubr.msk.f32.vlgmr.msra.gmra.mrb[6].mxu1 %vm254_vm2, %v2236_v63 }
 0x57f   :  { %1399 = vmatprep.mubr.f32.mxu1 %v2310_v15 }
 0x580   :  { %1239 = vrot.lane.b32.xlu0 %v1224_v61, %s2312_s22 }
 0x581   :  { %1237 = vrot.lane.b32.xlu1 %v1223_v62, %s2312_s22 }
 0x584   :  { %1486 = vrot.lane.b32.xlu0 %v2647_v46, %s2311_s0 }
 0x585   :  { %1484 = vrot.lane.b32.xlu1 %v2645_v45, %s2311_s0 }
 0x588   :  { %1492 = vrot.lane.b32.xlu0 %v2647_v46, %s2312_s22 }
 0x589   :  { %1490 = vrot.lane.b32.xlu1 %v2645_v45, %s2312_s22 }
 0x58c   :  { %1744 = vrot.lane.b32.xlu0 %v2690_v3, %s2311_s0 }
 0x58d   :  { %1742 = vrot.lane.b32.xlu1 %v2692_v6, %s2311_s0 }
 0x590   :  { %1750 = vrot.lane.b32.xlu0 %v2690_v3, %s2312_s22 }
 0x591   :  { %1748 = vrot.lane.b32.xlu1 %v2692_v6, %s2312_s22 }
 0x595   :  { %2003 = vperm.xlu1 %2303, %v2000_v39  }
 0x5ee   :  { %v1234_v40 = vpop.permute.xlu0 %1233 }
 0x5ef   :  { %v1232_v41 = vpop.permute.xlu1 %1231 }
 0x5f0   :  { %v1236_v42 = vsel %vm157_vm3, %v1234_v40, %v1232_v41  ;;  %v1235_v11 = vsel %vm157_vm3, %v1232_v41, %v1234_v40  ;;  %v2243_v40 = vld [vmem:[%s2835_s4 + $0x20] sm:$0xff] }
 0x5f1   :  { %v1245_v4 = vmul.f32 %v1236_v42, %v2512_v2  ;;  %v1246_v24 = vmul.f32 %v1235_v11, %v2514_v5  ;;  %v1250_v30 = vmul.f32 %v1235_v11, %v2529_v13  ;;  %v1249_v34 = vmul.f32 %v1236_v42, %v2531_v21 }
 0x5f2   :  { %v1240_v14 = vpop.permute.xlu0 %1239 }
 0x5f3   :  { %v1238_v20 = vpop.permute.xlu1 %1237 }
 0x5f4   :  { %v1241_v22 = vsel %vm164_vm4, %v1238_v20, %v1240_v14  ;;  %v1242_v23 = vsel %vm164_vm4, %v1240_v14, %v1238_v20 }
 0x5f5   :  { %v1243_v25 = vmul.f32 %v1241_v22, %v2519_v9  ;;  %v1244_v26 = vmul.f32 %v1242_v23, %v2521_v10  ;;  %v1252_v27 = vmul.f32 %v1242_v23, %v2523_v7  ;;  %v1251_v28 = vmul.f32 %v1241_v22, %v2527_v12 }
 0x5f6   :  { %v1487_v29 = vpop.permute.xlu0 %1486 }
 0x5f7   :  { %v1247_v31 = vadd.f32 %v1245_v4, %v1243_v25  ;;  %v1485_v32 = vpop.permute.xlu1 %1484  ;;  %v1248_v33 = vadd.f32 %v1246_v24, %v1244_v26  ;;  %v1254_v36 = vadd.f32 %v1252_v27, %v1250_v30  ;;  %v1253_v48 = vadd.f32 %v1251_v28, %v1249_v34  ;;  %v2026_v28 = vld [vmem:[%s2837_s11] sm:$0xff] }
 0x5f8   :  { %v1488_v37 = vsel %vm157_vm3, %v1485_v32, %v1487_v29  ;;  %v1489_v49 = vsel %vm157_vm3, %v1487_v29, %v1485_v32  ;;  %v2126_v29 = vld [vmem:[%s2838_s13] sm:$0xff] }
 0x5f9   :  { %1335 = vmatprep.subr.mxu1 %v1248_v33  ;;  %v1499_v50 = vmul.f32 %v1488_v37, %v2514_v5  ;;  %v1498_v54 = vmul.f32 %v1489_v49, %v2512_v2  ;;  %v1503_v61 = vmul.f32 %v1488_v37, %v2529_v13  ;;  %v1502_v39 = vmul.f32 %v1489_v49, %v2531_v21 }
 0x5fa   :  { %1336 = vmatpush1.msra.mxu1 %v1247_v31  ;;  %v1493_v38 = vpop.permute.xlu0 %1492 }
 0x5fb   :  { %v1491_v47 = vpop.permute.xlu1 %1490  ;;  %2238 = vmatmul.mubr.msk.f32.vlgmr.msra.gmra.mrb[6].mxu1 %vm254_vm2, %v1255_v35  ;;  %1411 = vmatprep.subr.mxu1 %v1254_v36 }
 0x5fc   :  { %v1494_v43 = vsel %vm164_vm4, %v1491_v47, %v1493_v38  ;;  %v1495_v44 = vsel %vm164_vm4, %v1493_v38, %v1491_v47  ;;  %1412 = vmatpush1.msra.mxu1 %v1253_v48  ;;  %1475 = vmatprep.mubr.f32.mxu1 %v2310_v15  ;;  %v2027_v48 = vld [vmem:[%s2837_s11 + $0x8] sm:$0xff] }
 0x5fd   :  { %v1497_v51 = vmul.f32 %v1495_v44, %v2521_v10  ;;  %v1496_v52 = vmul.f32 %v1494_v43, %v2519_v9  ;;  %v1505_v59 = vmul.f32 %v1495_v44, %v2523_v7 }
 0x5fe   :  { %v1745_v57 = vpop.permute.xlu0 %1744 }
 0x5ff   :  { %v1501_v53 = vadd.f32 %v1499_v50, %v1497_v51  ;;  %v1500_v56 = vadd.f32 %v1498_v54, %v1496_v52  ;;  %v1743_v58 = vpop.permute.xlu1 %1742  ;;  %v1507_v16 = vadd.f32 %v1505_v59, %v1503_v61  ;;  %v2024_v50 = vld [vmem:[%s2839_s10] sm:$0xff]  ;;  %v2025_v51 = vld [vmem:[%s2839_s10 + $0x8] sm:$0xff] }
 0x600   :  { %v1746_v18 = vsel %vm157_vm3, %v1743_v58, %v1745_v57 }
 0x601   :  { %1513 = vmatprep.subr.mxu1 %v1501_v53  ;;  %v1757_v41 = vmul.f32 %v1746_v18, %v2514_v5  ;;  %v2245_v5 = vld [vmem:[%s2835_s4 + $0x28] sm:$0xff] }
 0x602   :  { %v1751_v62 = vpop.permute.xlu0 %1750 }
 0x603   :  { %2240 = vmatmul.mubr.msk.f32.vlgmr.msra.gmra.mrb[6].mxu1 %vm254_vm2, %v2239_v55  ;;  %v1749_v63 = vpop.permute.xlu1 %1748 }
 0x604   :  { %1514 = vmatpush1.msra.mxu1 %v1500_v56  ;;  %1577 = vmatprep.mubr.f32.mxu1 %v2310_v15  ;;  %v1753_v17 = vsel %vm164_vm4, %v1751_v62, %v1749_v63 }
 0x605   :  { %1591 = vmatprep.subr.mxu1 %v2647_v46  ;;  %v1504_v46 = vmul.f32 %v1494_v43, %v2527_v12  ;;  %v1755_v19 = vmul.f32 %v1753_v17, %v2521_v10  ;;  %v1747_v10 = vsel %vm157_vm3, %v1745_v57, %v1743_v58  ;;  %v1763_v8 = vmul.f32 %v1753_v17, %v2523_v7  ;;  %v2249_v7 = vld [vmem:[%s2835_s4 + $0x38] sm:$0xff] }
 0x606   :  { %v1756_v20 = vmul.f32 %v1747_v10, %v2512_v2  ;;  %v1761_v2 = vmul.f32 %v1746_v18, %v2529_v13  ;;  %v2251_v13 = vld [vmem:[%s2835_s4 + $0x40] sm:$0xff] }
 0x607   :  { %v1506_v42 = vadd.f32 %v1504_v46, %v1502_v39  ;;  %v1759_v11 = vadd.f32 %v1757_v41, %v1755_v19 }
 0x608   :  { %v1765_v22 = vadd.f32 %v1763_v8, %v1761_v2 }
 0x60b   :  { %2242 = vmatmul.mubr.msk.f32.vlgmr.msra.gmra.mrb[6].mxu1 %vm254_vm2, %v2241_v60 }
 0x60c   :  { %1592 = vmatpush1.msra.mxu1 %v2645_v45  ;;  %1655 = vmatprep.mubr.f32.mxu1 %v2310_v15  ;;  %v1752_v45 = vsel %vm164_vm4, %v1749_v63, %v1751_v62 }
 0x60d   :  { %1669 = vmatprep.subr.mxu1 %v1507_v16  ;;  %v1754_v14 = vmul.f32 %v1752_v45, %v2519_v9  ;;  %v2247_v9 = vld [vmem:[%s2835_s4 + $0x30] sm:$0xff]  ;;  %v1762_v23 = vmul.f32 %v1752_v45, %v2527_v12 }
 0x60f   :  { %v1758_v4 = vadd.f32 %v1756_v20, %v1754_v14 }
 0x613   :  { %2244 = vmatmul.mubr.msk.f32.vlgmr.msra.gmra.mrb[6].mxu1 %vm254_vm2, %v2243_v40 }
 0x614   :  { %1670 = vmatpush1.msra.mxu1 %v1506_v42  ;;  %1733 = vmatprep.mubr.f32.mxu1 %v2310_v15 }
 0x615   :  { %1771 = vmatprep.subr.mxu1 %v1759_v11 }
 0x61b   :  { %2246 = vmatmul.mubr.msk.f32.vlgmr.msra.gmra.mrb[6].mxu1 %vm254_vm2, %v2245_v5 }
 0x61c   :  { %1772 = vmatpush1.msra.mxu1 %v1758_v4  ;;  %1835 = vmatprep.mubr.f32.mxu1 %v2310_v15 }
 0x61d   :  { %1849 = vmatprep.subr.mxu1 %v2690_v3  ;;  %v1760_v3 = vmul.f32 %v1747_v10, %v2531_v21 }
 0x61f   :  { %v1764_v24 = vadd.f32 %v1762_v23, %v1760_v3 }
 0x623   :  { %2248 = vmatmul.mubr.msk.f32.vlgmr.msra.gmra.mrb[6].mxu1 %vm254_vm2, %v2247_v9 }
 0x624   :  { %1850 = vmatpush1.msra.mxu1 %v2692_v6  ;;  %1913 = vmatprep.mubr.f32.mxu1 %v2310_v15  ;;  %v2004_v6 = vpop.permute.xlu1 %2003 }
 0x625   :  { %1927 = vmatprep.subr.mxu1 %v1765_v22 }
 0x62b   :  { %2250 = vmatmul.mubr.msk.f32.vlgmr.msra.gmra.mrb[6].mxu1 %vm254_vm2, %v2249_v7 }
 0x62c   :  { %1928 = vmatpush1.msra.mxu1 %v1764_v24  ;;  %1991 = vmatprep.mubr.f32.mxu1 %v2310_v15 }
 0x633   :  { %2252 = vmatmul.mubr.msk.f32.vlgmr.msra.gmra.mrb[6].mxu1 %vm254_vm2, %v2251_v13 }
 0x706   :  { %v1993_v12 = vpop.f32.mrb[6].mxu1 }
 0x707   :  { %v2006_v25 = vadd.f32 %v2004_v6, %v1993_v12  ;;  %v1995_v21 = vpop.f32.mrb[7].mxu1 }
 0x708   :  { %v2007_v26 = vadd.f32 %v2004_v6, %v1995_v21 }
 0x70a   :  { %v2008_v27 = vadd.f32 %v2007_v26, %v2006_v25 }
 0x70c   :  { %2009 = vadd.xlane.f32.xlu0 %v2008_v27 }
 0x722   :  { %2030 = vperm.xlu0 %2302, %v2026_v28  }
 0x726   :  { %2129 = vperm.xlu0 %2302, %v2126_v29  }
 0x799   :  { %v2010_v30 = vpop.xlane.xlu0 %2009 }
 0x79a   :  { %v2011_v31 = vmul.f32 0.00390625, %v2010_v30 }
 0x79c   :  { %v2012_v32 = vsub.f32 %v2006_v25, %v2011_v31  ;;  %v2013_v33 = vsub.f32 %v2007_v26, %v2011_v31 }
 0x79e   :  { %v2014_v34 = vmul.f32 %v2012_v32, %v2012_v32  ;;  %v2015_v35 = vmul.f32 %v2013_v33, %v2013_v33 }
 0x7a0   :  { %v2016_v36 = vadd.f32 %v2015_v35, %v2014_v34 }
 0x7a1   :  { %v2031_v54 = vpop.permute.xlu0 %2030 }
 0x7a2   :  { %2017 = vadd.xlane.f32.xlu1 %v2016_v36 }
 0x7a5   :  { %v2130_v19 = vpop.permute.xlu0 %2129 }
 0x7b3   :  { %2035 = vperm.xlu1 %2303, %v2027_v48  }
 0x82f   :  { %v2018_v37 = vpop.xlane.xlu1 %2017 }
 0x830   :  { %v2019_v38 = vmul.f32 0.00390625, %v2018_v37 }
 0x832   :  { %v2020_v47 = vadd.f32 1e-05, %v2019_v38 }
 0x833   :  { %v2036_v56 = vpop.permute.xlu1 %2035 }
 0x834   :  { %2306 = vrsqrt.f32 %v2020_v47 }
 0x83e   :  { %v2307_v43 = vpop.eup %2306 }
 0x83f   :  { %v2023_v44 = vmul.f32 %v2307_v43, %v2013_v33  ;;  %v2022_v49 = vmul.f32 %v2307_v43, %v2012_v32 }
 0x841   :  { %2044 = vmatprep.subr.mxu0 %v2023_v44 }
 0x842   :  { %2045 = vmatpush1.msra.mxu0 %v2022_v49 }
 0x843   :  { %2253 = vmatmul.mubr.msk.f32.vlgmr.msra.gmra.mrb[2].mxu0 %vm254_vm2, %v2024_v50 }
 0x844   :  { %2114 = vmatprep.mubr.f32.mxu0 %v2310_v15 }
 0x847   :  { %2254 = vmatmul.mubr.msk.f32.gmra.mrb[4].mxu0 %vm254_vm2, %v2025_v51 }
 0x848   :  { %2199 = vmatprep.mubr.f32.mxu0 %v2310_v15  ;;  %v2125_v15 = vld [vmem:[%s2840_s12] sm:$0xff] }
 0x916   :  { %v2110_v52 = vpop.f32.mrb[2].mxu0 }
 0x917   :  { %v2112_v53 = vpop.f32.mrb[3].mxu0  ;;  %v2111_v55 = vadd.f32 %v2110_v52, %v2031_v54 }
 0x918   :  { %v2113_v57 = vadd.f32 %v2112_v53, %v2031_v54 }
 0x919   :  { %v2121_v62 = vmax.f32 %v2111_v55, 0.0 }
 0x91a   :  { %v2116_v58 = vpop.f32.mrb[4].mxu0  ;;  %v2122_v16 = vmax.f32 %v2113_v57, 0.0 }
 0x91b   :  { %v2117_v59 = vadd.f32 %v2116_v58, %v2036_v56  ;;  %v2118_v60 = vpop.f32.mrb[5].mxu0 }
 0x91c   :  { %v2119_v61 = vadd.f32 %v2118_v60, %v2036_v56 }
 0x91d   :  { %v2123_v63 = vmax.f32 %v2117_v59, 0.0 }
 0x91e   :  { %v2124_v17 = vmax.f32 %v2119_v61, 0.0 }
 0x91f   :  { %v2262_v46 = vpack.c.bf16 %v2123_v63, %v2121_v62 }
 0x920   :  { %v2260_v18 = vpack.c.bf16 %v2124_v17, %v2122_v16 }
 0x922   :  { %2261 = vmatprep.subr.bf16.mxu0 %v2260_v18 }
 0x923   :  { %2263 = vmatpush1.bf16.msra.mxu0 %v2262_v46 }
 0x926   :  { %2255 = vmatmul.mubr.msk.f32.vlgmr.msra.gmra.mrb[6].mxu0 %vm1130_vm5, %v2125_v15 }
 0x9f9   :  { %v2201_v39 = vpop.f32.mrb[6].mxu0 }
 0x9fa   :  { %v2202_v40 = vadd.f32 %v2201_v39, %v2130_v19  ;;  %v2203_v41 = vpop.f32.mrb[7].mxu0 }
 0x9fb   :  { %v2204_v42 = vadd.f32 %v2203_v41, %v2130_v19 }
 0x9fc   :  { %v2206_v45 = vmax.f32 %v2202_v40, 0.0 }
 0x9fd   :  { %v2207_v11 = vmax.f32 %v2204_v42, 0.0 }
 0x9fe   :  { %v2208_v10 = vadd.f32 %v2206_v45, %v2392_v0 }
 0x9ff   :  { %v2209_v14 = vadd.f32 %v2207_v11, %v2401_v1 }
 0xa00   :  { %2210 = vst [vmem:[%s2841_s14] sm:$0xff] %v2208_v10 }
 0xa01   :  { %2211 = vst [vmem:[%s2841_s14 + $0x8] sm:$0xff] %v2209_v14 }

</bundles_post_ra>
